<compile_context>
chip_gen: v6e
topology: v6e:2x2x1
jax: 0.10.0
libtpu: 0.0.40
codegen_flags: <defaults>
</compile_context>

<pallas_src>
import functools

import jax
import jax.numpy as jnp
import numpy as np
from jax.experimental import pallas as pl
from jax.experimental.pallas import tpu as pltpu


# ------------------------------ Pallas kernel --------------------------------

def _fused_forward_kernel(x_ref, w1_ref, s1_ref, w2_ref, s2_ref, w3_ref, s3_ref,
                          w4_ref, s4_ref, wh_ref, bh_ref, y_ref):
    """Whole forward: 4 conv blocks (banded / dense matmuls) + fused D1/D2 heads."""
    f32, bf16 = jnp.float32, jnp.bfloat16
    m = x_ref.shape[0]                       # 2N (both images share the trunk)

    def leaky(v):                            # LeakyReLU(0.2): one vmul + one vmax
        return jnp.maximum(v, 0.2 * v)

    def band_block(h_pad, w_ref_, s_ref_, n_rows, row_w):
        # h_pad : (M, Hpad*row_w) f32, NHWC-flat with a physical zero row on top.
        # w_ref_: (3*row_w, OW*Cout) bf16 band, identical for every output row.
        # s_ref_: (1, OW*Cout) f32 fused conv-bias / BN shift.
        w = w_ref_[...]
        s = s_ref_[...]
        parts = []
        for oh in range(n_rows):             # static unroll; slab starts 128-aligned
            slab = h_pad[:, 2 * oh * row_w: (2 * oh + 3) * row_w]
            y = jnp.dot(slab.astype(bf16), w, preferred_element_type=f32) + s
            parts.append(leaky(y))
        return parts                          # n_rows x (M, OW*Cout)

    zpad = jnp.zeros((m, 128), f32)           # zero pad row-block for layers 2/3

    x = x_ref[...]                            # (2N, 18*16*4 = 1152) padded NHWC-flat

    # Block 1: 16x16x4 -> 8x8x16 (no BN)
    p1 = band_block(x, w1_ref, s1_ref, n_rows=8, row_w=64)    # 8 x (2N, 128)
    h1 = jnp.concatenate([zpad] + p1, axis=1)                 # (2N, 9*128 = 1152)
    # Block 2: 8x8x16 -> 4x4x32 (BN folded)
    p2 = band_block(h1, w2_ref, s2_ref, n_rows=4, row_w=128)  # 4 x (2N, 128)
    h2 = jnp.concatenate([zpad] + p2, axis=1)                 # (2N, 640)
    # Block 3: 4x4x32 -> 2x2x64 (BN folded)
    p3 = band_block(h2, w3_ref, s3_ref, n_rows=2, row_w=128)  # 2 x (2N, 128)
    h3 = jnp.concatenate(p3, axis=1)                          # (2N, 256)
    # Block 4: 2x2x64 -> 1x1x128 (BN folded; exactly dense)
    h4 = leaky(jnp.dot(h3.astype(bf16), w4_ref[...],
                       preferred_element_type=f32) + s4_ref[...])   # (2N, 128)
    # TODO(synk): Dropout2d(0.25) and BN running-stat updates are eval-mode
    # identity; train-mode behaviour is intentionally not modeled.

    # Fused heads: column 0 = D1, column 1 = D2, columns 2..127 are zero padding so
    # the single output store is lane-dense (no vst.msk, one writeback DMA).
    y = jnp.dot(h4.astype(bf16), wh_ref[...],
                preferred_element_type=f32) + bh_ref[...]            # (2N, 128)
    y_ref[...] = y


def _full_spec(shape):
    # Whole-array block (no grid): block_shape == full array dims.
    return pl.BlockSpec(shape, lambda: (0,) * len(shape))


def coupled_discriminators(img1_nchw, img2_nchw, params):
    n, c, h, w = img1_nchw.shape
    # One small prep fusion (~16 KiB): stack both images (shared trunk), go NCHW ->
    # NHWC, add one zero row top+bottom (top = conv padding, bottom = lane density),
    # and flatten.  This is what lets layer 1 use a 48 KiB band weight instead of a
    # 4 MiB dense Toeplitz matrix -- the kernel is weight-DMA bound.
    x = jnp.concatenate([img1_nchw, img2_nchw], axis=0).astype(jnp.float32)
    x = jnp.transpose(x, (0, 2, 3, 1))                       # (2N, H, W, C)
    x = jnp.pad(x, ((0, 0), (1, 1), (0, 0), (0, 0)))         # (2N, H+2, W, C)
    x = x.reshape(2 * n, (h + 2) * w * c)                    # (2N, 1152)

    args = (x,
            params["w1"], params["s1"], params["w2"], params["s2"],
            params["w3"], params["s3"], params["w4"], params["s4"],
            params["wh"], params["bh"])

    y = pl.pallas_call(
        _fused_forward_kernel,
        out_shape=jax.ShapeDtypeStruct((2 * n, 128), jnp.float32),
        in_specs=[_full_spec(a.shape) for a in args],
        out_specs=_full_spec((2 * n, 128)),
        # Actual footprint is < 1 MiB; keep the VMEM claim small (v7x has 64 MiB).
        compiler_params=pltpu.CompilerParams(vmem_limit_bytes=8 * 1024 * 1024),
    )(*args)

    # Row split: first N rows are img1 (D1 column), last N rows img2 (D2 column).
    return y[:n, 0:1], y[n:, 1:2]


# --------------------- init-time parameter preprocessing ---------------------

def _conv_band(w_conv, w_spatial, cin, cout):
    """Row-band matrix for Conv2d(k=3, s=2, p=1) over an NHWC-flat input that has a
    physical zero pad row on top.  Shape (3*W*Cin, OW*Cout); identical for every
    output row oh (slab = padded rows {2oh, 2oh+1, 2oh+2})."""
    w_np = np.asarray(w_conv, np.float32)                    # (Cout, Cin, 3, 3)
    ow_n = w_spatial // 2
    band = np.zeros((3 * w_spatial * cin, ow_n * cout), np.float32)
    ci = np.arange(cin)
    for kh in range(3):
        for ow in range(ow_n):
            for kw in range(3):
                ww = 2 * ow + kw - 1
                if ww < 0 or ww >= w_spatial:                # width zero-padding
                    continue
                rows = (kh * w_spatial + ww) * cin + ci
                band[rows, ow * cout:(ow + 1) * cout] = w_np[:, :, kh, kw].T
    return band


def _conv_dense_last(w_conv, h, cin, cout):
    """Dense (H*W*Cin, OH*OW*Cout) matrix for Conv2d(k=3,s=2,p=1), channel-last rows
    and columns.  Used for the last block (2x2 -> 1x1), where it is fully dense."""
    w_np = np.asarray(w_conv, np.float32)
    oh_n = h // 2
    mat = np.zeros((h * h * cin, oh_n * oh_n * cout), np.float32)
    ci = np.arange(cin)
    for oh in range(oh_n):
        for ow in range(oh_n):
            col = (oh * oh_n + ow) * cout
            for kh in range(3):
                hh = 2 * oh + kh - 1
                if hh < 0 or hh >= h:
                    continue
                for kw in range(3):
                    ww = 2 * ow + kw - 1
                    if ww < 0 or ww >= h:
                        continue
                    rows = (hh * h + ww) * cin + ci
                    mat[rows, col:col + cout] = w_np[:, :, kh, kw].T
    return mat


def init_params(key, channels, img_size):
    """Deterministic synthetic parameters, pre-lowered to band/dense matmul form.

    Weights are stored in bfloat16 (the kernel accumulates in f32 on the MXU);
    shifts stay f32.  This halves-to-quarters the HBM weight traffic at a small,
    deliberate precision cost vs. the f32 PyTorch reference.
    """
    assert img_size == 16, "band layout / lane alignment derived for img_size=16"
    bn_eps = 0.8  # nn.BatchNorm2d(out_filters, 0.8) -> eps=0.8
    specs = [(channels, 16, False), (16, 32, True), (32, 64, True), (64, 128, True)]
    params = {}
    h = img_size
    for idx, (cin, cout, bn) in enumerate(specs, start=1):
        key, kw_, kb_, kg_, kbe_ = jax.random.split(key, 5)
        wconv = jax.random.normal(kw_, (cout, cin, 3, 3), jnp.float32) * 0.05
        b = jax.random.normal(kb_, (cout,), jnp.float32) * 0.05
        if bn:
            gamma = 1.0 + 0.1 * jax.random.normal(kg_, (cout,), jnp.float32)
            beta = 0.1 * jax.random.normal(kbe_, (cout,), jnp.float32)
            run_mean = jnp.zeros((cout,), jnp.float32)
            run_var = jnp.ones((cout,), jnp.float32)
            scale = gamma / jnp.sqrt(run_var + bn_eps)
            shift = (b - run_mean) * scale + beta
        else:
            scale = jnp.ones((cout,), jnp.float32)
            shift = b
        scale_np = np.asarray(scale, np.float32)
        shift_np = np.asarray(shift, np.float32)
        ow_n = h // 2
        if idx < 4:
            mat = _conv_band(wconv, h, cin, cout)            # (3*W*Cin, OW*Cout)
            mat = mat * np.tile(scale_np, ow_n)[None, :]     # fold BN/bias scale
            shift_vec = np.tile(shift_np, ow_n)[None, :]     # (1, OW*Cout)
        else:
            mat = _conv_dense_last(wconv, h, cin, cout)      # (256, 128), dense
            mat = mat * scale_np[None, :]
            shift_vec = shift_np[None, :]                    # (1, 128)
        params[f"w{idx}"] = jnp.asarray(mat, jnp.bfloat16)
        params[f"s{idx}"] = jnp.asarray(shift_vec, jnp.float32)
        h = ow_n

    # Heads: fused into one lane-dense (128, 128) matrix; col 0 = D1, col 1 = D2.
    ds_size = img_size // 2 ** 4
    feat = 128 * ds_size ** 2
    head_w, head_b = [], []
    for _ in ("D1", "D2"):
        key, kw_, kb_ = jax.random.split(key, 3)
        head_w.append(np.asarray(jax.random.normal(kw_, (1, feat), jnp.float32) * 0.05))
        head_b.append(np.asarray(jax.random.normal(kb_, (1,), jnp.float32) * 0.05))
    # PyTorch flattens NCHW (c, oh, ow); our trunk features are (oh, ow, c): remap.
    idxs = np.arange(feat)
    pos, ch = idxs // 128, idxs % 128
    nchw_rows = ch * (ds_size ** 2) + pos                    # identity when ds==1
    wh = np.zeros((feat, 128), np.float32)
    wh[:, 0] = head_w[0][0, nchw_rows]
    wh[:, 1] = head_w[1][0, nchw_rows]
    bh = np.zeros((1, 128), np.float32)
    bh[0, 0] = head_b[0][0]
    bh[0, 1] = head_b[1][0]
    params["wh"] = jnp.asarray(wh, jnp.bfloat16)
    params["bh"] = jnp.asarray(bh, jnp.float32)
    return params


# ----------------------------------- main ------------------------------------

if __name__ == "__main__":
    batch, channels, img_size = 2, 4, 16  # opt.channels=4, opt.img_size=16
    key = jax.random.PRNGKey(0)
    k_params, k1, k2 = jax.random.split(key, 3)

    params = init_params(k_params, channels, img_size)
    img1 = jax.random.normal(k1, (batch, channels, img_size, img_size), jnp.float32)
    img2 = jax.random.normal(k2, (batch, channels, img_size, img_size), jnp.float32)

    fwd = jax.jit(functools.partial(coupled_discriminators, params=params))
    v1, v2 = fwd(img1, img2)
    jax.block_until_ready((v1, v2))
    assert v1.shape == (batch, 1) and v2.shape == (batch, 1)
    print("KERNEL_OK")
</pallas_src>

<mosaic_0001>
module attributes {stable_mosaic.version = 11 : i64} {
  func.func @_fused_forward_kernel(%arg0: memref<4x1152xf32, #tpu.memory_space<vmem>>, %arg1: memref<192x128xbf16, #tpu.memory_space<vmem>>, %arg2: memref<1x128xf32, #tpu.memory_space<vmem>>, %arg3: memref<384x128xbf16, #tpu.memory_space<vmem>>, %arg4: memref<1x128xf32, #tpu.memory_space<vmem>>, %arg5: memref<384x128xbf16, #tpu.memory_space<vmem>>, %arg6: memref<1x128xf32, #tpu.memory_space<vmem>>, %arg7: memref<256x128xbf16, #tpu.memory_space<vmem>>, %arg8: memref<1x128xf32, #tpu.memory_space<vmem>>, %arg9: memref<128x128xbf16, #tpu.memory_space<vmem>>, %arg10: memref<1x128xf32, #tpu.memory_space<vmem>>, %arg11: memref<4x128xf32, #tpu.memory_space<vmem>>) attributes {dimension_semantics = [], scalar_prefetch = 0 : i64, scratch_operands = 0 : i64, tpu.core_type = #tpu.core_type<tc>} {
    %cst = arith.constant 0.000000e+00 : f32
    %0 = vector.broadcast %cst : f32 to vector<4x128xf32>
    %c0 = arith.constant 0 : index
    %c0_0 = arith.constant 0 : index
    %1 = vector.load %arg0[%c0, %c0_0] : memref<4x1152xf32, #tpu.memory_space<vmem>>, vector<4x1152xf32>
    %c0_1 = arith.constant 0 : index
    %c0_2 = arith.constant 0 : index
    %2 = vector.load %arg1[%c0_1, %c0_2] : memref<192x128xbf16, #tpu.memory_space<vmem>>, vector<192x128xbf16>
    %c0_3 = arith.constant 0 : index
    %c0_4 = arith.constant 0 : index
    %3 = vector.load %arg2[%c0_3, %c0_4] : memref<1x128xf32, #tpu.memory_space<vmem>>, vector<1x128xf32>
    %4 = vector.extract_strided_slice %1 {offsets = [0, 0], sizes = [4, 192], strides = [1, 1]} : vector<4x1152xf32> to vector<4x192xf32>
    %5 = arith.truncf %4 : vector<4x192xf32> to vector<4x192xbf16>
    %cst_5 = arith.constant dense<0.000000e+00> : vector<4x128xf32>
    %6 = tpu.matmul %5, %2, %cst_5 {dimension_numbers = #tpu.dot_dimension_numbers<[1], [0], [0], [1], [0, 0, 1, 1], [], []>} : vector<4x192xbf16>, vector<192x128xbf16>, vector<4x128xf32> -> vector<4x128xf32>
    %7 = vector.broadcast %3 : vector<1x128xf32> to vector<4x128xf32>
    %8 = arith.addf %6, %7 : vector<4x128xf32>
    %cst_6 = arith.constant 2.000000e-01 : f32
    %9 = vector.broadcast %cst_6 : f32 to vector<4x128xf32>
    %10 = arith.mulf %9, %8 : vector<4x128xf32>
    %11 = arith.maximumf %8, %10 : vector<4x128xf32>
    %12 = vector.extract_strided_slice %1 {offsets = [0, 128], sizes = [4, 192], strides = [1, 1]} : vector<4x1152xf32> to vector<4x192xf32>
    %13 = arith.truncf %12 : vector<4x192xf32> to vector<4x192xbf16>
    %cst_7 = arith.constant dense<0.000000e+00> : vector<4x128xf32>
    %14 = tpu.matmul %13, %2, %cst_7 {dimension_numbers = #tpu.dot_dimension_numbers<[1], [0], [0], [1], [0, 0, 1, 1], [], []>} : vector<4x192xbf16>, vector<192x128xbf16>, vector<4x128xf32> -> vector<4x128xf32>
    %15 = vector.broadcast %3 : vector<1x128xf32> to vector<4x128xf32>
    %16 = arith.addf %14, %15 : vector<4x128xf32>
    %cst_8 = arith.constant 2.000000e-01 : f32
    %17 = vector.broadcast %cst_8 : f32 to vector<4x128xf32>
    %18 = arith.mulf %17, %16 : vector<4x128xf32>
    %19 = arith.maximumf %16, %18 : vector<4x128xf32>
    %20 = vector.extract_strided_slice %1 {offsets = [0, 256], sizes = [4, 192], strides = [1, 1]} : vector<4x1152xf32> to vector<4x192xf32>
    %21 = arith.truncf %20 : vector<4x192xf32> to vector<4x192xbf16>
    %cst_9 = arith.constant dense<0.000000e+00> : vector<4x128xf32>
    %22 = tpu.matmul %21, %2, %cst_9 {dimension_numbers = #tpu.dot_dimension_numbers<[1], [0], [0], [1], [0, 0, 1, 1], [], []>} : vector<4x192xbf16>, vector<192x128xbf16>, vector<4x128xf32> -> vector<4x128xf32>
    %23 = vector.broadcast %3 : vector<1x128xf32> to vector<4x128xf32>
    %24 = arith.addf %22, %23 : vector<4x128xf32>
    %cst_10 = arith.constant 2.000000e-01 : f32
    %25 = vector.broadcast %cst_10 : f32 to vector<4x128xf32>
    %26 = arith.mulf %25, %24 : vector<4x128xf32>
    %27 = arith.maximumf %24, %26 : vector<4x128xf32>
    %28 = vector.extract_strided_slice %1 {offsets = [0, 384], sizes = [4, 192], strides = [1, 1]} : vector<4x1152xf32> to vector<4x192xf32>
    %29 = arith.truncf %28 : vector<4x192xf32> to vector<4x192xbf16>
    %cst_11 = arith.constant dense<0.000000e+00> : vector<4x128xf32>
    %30 = tpu.matmul %29, %2, %cst_11 {dimension_numbers = #tpu.dot_dimension_numbers<[1], [0], [0], [1], [0, 0, 1, 1], [], []>} : vector<4x192xbf16>, vector<192x128xbf16>, vector<4x128xf32> -> vector<4x128xf32>
    %31 = vector.broadcast %3 : vector<1x128xf32> to vector<4x128xf32>
    %32 = arith.addf %30, %31 : vector<4x128xf32>
    %cst_12 = arith.constant 2.000000e-01 : f32
    %33 = vector.broadcast %cst_12 : f32 to vector<4x128xf32>
    %34 = arith.mulf %33, %32 : vector<4x128xf32>
    %35 = arith.maximumf %32, %34 : vector<4x128xf32>
    %36 = vector.extract_strided_slice %1 {offsets = [0, 512], sizes = [4, 192], strides = [1, 1]} : vector<4x1152xf32> to vector<4x192xf32>
    %37 = arith.truncf %36 : vector<4x192xf32> to vector<4x192xbf16>
    %cst_13 = arith.constant dense<0.000000e+00> : vector<4x128xf32>
    %38 = tpu.matmul %37, %2, %cst_13 {dimension_numbers = #tpu.dot_dimension_numbers<[1], [0], [0], [1], [0, 0, 1, 1], [], []>} : vector<4x192xbf16>, vector<192x128xbf16>, vector<4x128xf32> -> vector<4x128xf32>
    %39 = vector.broadcast %3 : vector<1x128xf32> to vector<4x128xf32>
    %40 = arith.addf %38, %39 : vector<4x128xf32>
    %cst_14 = arith.constant 2.000000e-01 : f32
    %41 = vector.broadcast %cst_14 : f32 to vector<4x128xf32>
    %42 = arith.mulf %41, %40 : vector<4x128xf32>
    %43 = arith.maximumf %40, %42 : vector<4x128xf32>
    %44 = vector.extract_strided_slice %1 {offsets = [0, 640], sizes = [4, 192], strides = [1, 1]} : vector<4x1152xf32> to vector<4x192xf32>
    %45 = arith.truncf %44 : vector<4x192xf32> to vector<4x192xbf16>
    %cst_15 = arith.constant dense<0.000000e+00> : vector<4x128xf32>
    %46 = tpu.matmul %45, %2, %cst_15 {dimension_numbers = #tpu.dot_dimension_numbers<[1], [0], [0], [1], [0, 0, 1, 1], [], []>} : vector<4x192xbf16>, vector<192x128xbf16>, vector<4x128xf32> -> vector<4x128xf32>
    %47 = vector.broadcast %3 : vector<1x128xf32> to vector<4x128xf32>
    %48 = arith.addf %46, %47 : vector<4x128xf32>
    %cst_16 = arith.constant 2.000000e-01 : f32
    %49 = vector.broadcast %cst_16 : f32 to vector<4x128xf32>
    %50 = arith.mulf %49, %48 : vector<4x128xf32>
    %51 = arith.maximumf %48, %50 : vector<4x128xf32>
    %52 = vector.extract_strided_slice %1 {offsets = [0, 768], sizes = [4, 192], strides = [1, 1]} : vector<4x1152xf32> to vector<4x192xf32>
    %53 = arith.truncf %52 : vector<4x192xf32> to vector<4x192xbf16>
    %cst_17 = arith.constant dense<0.000000e+00> : vector<4x128xf32>
    %54 = tpu.matmul %53, %2, %cst_17 {dimension_numbers = #tpu.dot_dimension_numbers<[1], [0], [0], [1], [0, 0, 1, 1], [], []>} : vector<4x192xbf16>, vector<192x128xbf16>, vector<4x128xf32> -> vector<4x128xf32>
    %55 = vector.broadcast %3 : vector<1x128xf32> to vector<4x128xf32>
    %56 = arith.addf %54, %55 : vector<4x128xf32>
    %cst_18 = arith.constant 2.000000e-01 : f32
    %57 = vector.broadcast %cst_18 : f32 to vector<4x128xf32>
    %58 = arith.mulf %57, %56 : vector<4x128xf32>
    %59 = arith.maximumf %56, %58 : vector<4x128xf32>
    %60 = vector.extract_strided_slice %1 {offsets = [0, 896], sizes = [4, 192], strides = [1, 1]} : vector<4x1152xf32> to vector<4x192xf32>
    %61 = arith.truncf %60 : vector<4x192xf32> to vector<4x192xbf16>
    %cst_19 = arith.constant dense<0.000000e+00> : vector<4x128xf32>
    %62 = tpu.matmul %61, %2, %cst_19 {dimension_numbers = #tpu.dot_dimension_numbers<[1], [0], [0], [1], [0, 0, 1, 1], [], []>} : vector<4x192xbf16>, vector<192x128xbf16>, vector<4x128xf32> -> vector<4x128xf32>
    %63 = vector.broadcast %3 : vector<1x128xf32> to vector<4x128xf32>
    %64 = arith.addf %62, %63 : vector<4x128xf32>
    %cst_20 = arith.constant 2.000000e-01 : f32
    %65 = vector.broadcast %cst_20 : f32 to vector<4x128xf32>
    %66 = arith.mulf %65, %64 : vector<4x128xf32>
    %67 = arith.maximumf %64, %66 : vector<4x128xf32>
    %68 = tpu.concatenate %0, %11, %19, %27, %35, %43, %51, %59, %67 in 1 : vector<4x128xf32>, vector<4x128xf32>, vector<4x128xf32>, vector<4x128xf32>, vector<4x128xf32>, vector<4x128xf32>, vector<4x128xf32>, vector<4x128xf32>, vector<4x128xf32> -> vector<4x1152xf32>
    %c0_21 = arith.constant 0 : index
    %c0_22 = arith.constant 0 : index
    %69 = vector.load %arg3[%c0_21, %c0_22] : memref<384x128xbf16, #tpu.memory_space<vmem>>, vector<384x128xbf16>
    %c0_23 = arith.constant 0 : index
    %c0_24 = arith.constant 0 : index
    %70 = vector.load %arg4[%c0_23, %c0_24] : memref<1x128xf32, #tpu.memory_space<vmem>>, vector<1x128xf32>
    %71 = vector.extract_strided_slice %68 {offsets = [0, 0], sizes = [4, 384], strides = [1, 1]} : vector<4x1152xf32> to vector<4x384xf32>
    %72 = arith.truncf %71 : vector<4x384xf32> to vector<4x384xbf16>
    %cst_25 = arith.constant dense<0.000000e+00> : vector<4x128xf32>
    %73 = tpu.matmul %72, %69, %cst_25 {dimension_numbers = #tpu.dot_dimension_numbers<[1], [0], [0], [1], [0, 0, 1, 1], [], []>} : vector<4x384xbf16>, vector<384x128xbf16>, vector<4x128xf32> -> vector<4x128xf32>
    %74 = vector.broadcast %70 : vector<1x128xf32> to vector<4x128xf32>
    %75 = arith.addf %73, %74 : vector<4x128xf32>
    %cst_26 = arith.constant 2.000000e-01 : f32
    %76 = vector.broadcast %cst_26 : f32 to vector<4x128xf32>
    %77 = arith.mulf %76, %75 : vector<4x128xf32>
    %78 = arith.maximumf %75, %77 : vector<4x128xf32>
    %79 = vector.extract_strided_slice %68 {offsets = [0, 256], sizes = [4, 384], strides = [1, 1]} : vector<4x1152xf32> to vector<4x384xf32>
    %80 = arith.truncf %79 : vector<4x384xf32> to vector<4x384xbf16>
    %cst_27 = arith.constant dense<0.000000e+00> : vector<4x128xf32>
    %81 = tpu.matmul %80, %69, %cst_27 {dimension_numbers = #tpu.dot_dimension_numbers<[1], [0], [0], [1], [0, 0, 1, 1], [], []>} : vector<4x384xbf16>, vector<384x128xbf16>, vector<4x128xf32> -> vector<4x128xf32>
    %82 = vector.broadcast %70 : vector<1x128xf32> to vector<4x128xf32>
    %83 = arith.addf %81, %82 : vector<4x128xf32>
    %cst_28 = arith.constant 2.000000e-01 : f32
    %84 = vector.broadcast %cst_28 : f32 to vector<4x128xf32>
    %85 = arith.mulf %84, %83 : vector<4x128xf32>
    %86 = arith.maximumf %83, %85 : vector<4x128xf32>
    %87 = vector.extract_strided_slice %68 {offsets = [0, 512], sizes = [4, 384], strides = [1, 1]} : vector<4x1152xf32> to vector<4x384xf32>
    %88 = arith.truncf %87 : vector<4x384xf32> to vector<4x384xbf16>
    %cst_29 = arith.constant dense<0.000000e+00> : vector<4x128xf32>
    %89 = tpu.matmul %88, %69, %cst_29 {dimension_numbers = #tpu.dot_dimension_numbers<[1], [0], [0], [1], [0, 0, 1, 1], [], []>} : vector<4x384xbf16>, vector<384x128xbf16>, vector<4x128xf32> -> vector<4x128xf32>
    %90 = vector.broadcast %70 : vector<1x128xf32> to vector<4x128xf32>
    %91 = arith.addf %89, %90 : vector<4x128xf32>
    %cst_30 = arith.constant 2.000000e-01 : f32
    %92 = vector.broadcast %cst_30 : f32 to vector<4x128xf32>
    %93 = arith.mulf %92, %91 : vector<4x128xf32>
    %94 = arith.maximumf %91, %93 : vector<4x128xf32>
    %95 = vector.extract_strided_slice %68 {offsets = [0, 768], sizes = [4, 384], strides = [1, 1]} : vector<4x1152xf32> to vector<4x384xf32>
    %96 = arith.truncf %95 : vector<4x384xf32> to vector<4x384xbf16>
    %cst_31 = arith.constant dense<0.000000e+00> : vector<4x128xf32>
    %97 = tpu.matmul %96, %69, %cst_31 {dimension_numbers = #tpu.dot_dimension_numbers<[1], [0], [0], [1], [0, 0, 1, 1], [], []>} : vector<4x384xbf16>, vector<384x128xbf16>, vector<4x128xf32> -> vector<4x128xf32>
    %98 = vector.broadcast %70 : vector<1x128xf32> to vector<4x128xf32>
    %99 = arith.addf %97, %98 : vector<4x128xf32>
    %cst_32 = arith.constant 2.000000e-01 : f32
    %100 = vector.broadcast %cst_32 : f32 to vector<4x128xf32>
    %101 = arith.mulf %100, %99 : vector<4x128xf32>
    %102 = arith.maximumf %99, %101 : vector<4x128xf32>
    %103 = tpu.concatenate %0, %78, %86, %94, %102 in 1 : vector<4x128xf32>, vector<4x128xf32>, vector<4x128xf32>, vector<4x128xf32>, vector<4x128xf32> -> vector<4x640xf32>
    %c0_33 = arith.constant 0 : index
    %c0_34 = arith.constant 0 : index
    %104 = vector.load %arg5[%c0_33, %c0_34] : memref<384x128xbf16, #tpu.memory_space<vmem>>, vector<384x128xbf16>
    %c0_35 = arith.constant 0 : index
    %c0_36 = arith.constant 0 : index
    %105 = vector.load %arg6[%c0_35, %c0_36] : memref<1x128xf32, #tpu.memory_space<vmem>>, vector<1x128xf32>
    %106 = vector.extract_strided_slice %103 {offsets = [0, 0], sizes = [4, 384], strides = [1, 1]} : vector<4x640xf32> to vector<4x384xf32>
    %107 = arith.truncf %106 : vector<4x384xf32> to vector<4x384xbf16>
    %cst_37 = arith.constant dense<0.000000e+00> : vector<4x128xf32>
    %108 = tpu.matmul %107, %104, %cst_37 {dimension_numbers = #tpu.dot_dimension_numbers<[1], [0], [0], [1], [0, 0, 1, 1], [], []>} : vector<4x384xbf16>, vector<384x128xbf16>, vector<4x128xf32> -> vector<4x128xf32>
    %109 = vector.broadcast %105 : vector<1x128xf32> to vector<4x128xf32>
    %110 = arith.addf %108, %109 : vector<4x128xf32>
    %cst_38 = arith.constant 2.000000e-01 : f32
    %111 = vector.broadcast %cst_38 : f32 to vector<4x128xf32>
    %112 = arith.mulf %111, %110 : vector<4x128xf32>
    %113 = arith.maximumf %110, %112 : vector<4x128xf32>
    %114 = vector.extract_strided_slice %103 {offsets = [0, 256], sizes = [4, 384], strides = [1, 1]} : vector<4x640xf32> to vector<4x384xf32>
    %115 = arith.truncf %114 : vector<4x384xf32> to vector<4x384xbf16>
    %cst_39 = arith.constant dense<0.000000e+00> : vector<4x128xf32>
    %116 = tpu.matmul %115, %104, %cst_39 {dimension_numbers = #tpu.dot_dimension_numbers<[1], [0], [0], [1], [0, 0, 1, 1], [], []>} : vector<4x384xbf16>, vector<384x128xbf16>, vector<4x128xf32> -> vector<4x128xf32>
    %117 = vector.broadcast %105 : vector<1x128xf32> to vector<4x128xf32>
    %118 = arith.addf %116, %117 : vector<4x128xf32>
    %cst_40 = arith.constant 2.000000e-01 : f32
    %119 = vector.broadcast %cst_40 : f32 to vector<4x128xf32>
    %120 = arith.mulf %119, %118 : vector<4x128xf32>
    %121 = arith.maximumf %118, %120 : vector<4x128xf32>
    %122 = tpu.concatenate %113, %121 in 1 : vector<4x128xf32>, vector<4x128xf32> -> vector<4x256xf32>
    %123 = arith.truncf %122 : vector<4x256xf32> to vector<4x256xbf16>
    %c0_41 = arith.constant 0 : index
    %c0_42 = arith.constant 0 : index
    %124 = vector.load %arg7[%c0_41, %c0_42] : memref<256x128xbf16, #tpu.memory_space<vmem>>, vector<256x128xbf16>
    %cst_43 = arith.constant dense<0.000000e+00> : vector<4x128xf32>
    %125 = tpu.matmul %123, %124, %cst_43 {dimension_numbers = #tpu.dot_dimension_numbers<[1], [0], [0], [1], [0, 0, 1, 1], [], []>} : vector<4x256xbf16>, vector<256x128xbf16>, vector<4x128xf32> -> vector<4x128xf32>
    %c0_44 = arith.constant 0 : index
    %c0_45 = arith.constant 0 : index
    %126 = vector.load %arg8[%c0_44, %c0_45] : memref<1x128xf32, #tpu.memory_space<vmem>>, vector<1x128xf32>
    %127 = vector.broadcast %126 : vector<1x128xf32> to vector<4x128xf32>
    %128 = arith.addf %125, %127 : vector<4x128xf32>
    %cst_46 = arith.constant 2.000000e-01 : f32
    %129 = vector.broadcast %cst_46 : f32 to vector<4x128xf32>
    %130 = arith.mulf %129, %128 : vector<4x128xf32>
    %131 = arith.maximumf %128, %130 : vector<4x128xf32>
    %132 = arith.truncf %131 : vector<4x128xf32> to vector<4x128xbf16>
    %c0_47 = arith.constant 0 : index
    %c0_48 = arith.constant 0 : index
    %133 = vector.load %arg9[%c0_47, %c0_48] : memref<128x128xbf16, #tpu.memory_space<vmem>>, vector<128x128xbf16>
    %cst_49 = arith.constant dense<0.000000e+00> : vector<4x128xf32>
    %134 = tpu.matmul %132, %133, %cst_49 {dimension_numbers = #tpu.dot_dimension_numbers<[1], [0], [0], [1], [0, 0, 1, 1], [], []>} : vector<4x128xbf16>, vector<128x128xbf16>, vector<4x128xf32> -> vector<4x128xf32>
    %c0_50 = arith.constant 0 : index
    %c0_51 = arith.constant 0 : index
    %135 = vector.load %arg10[%c0_50, %c0_51] : memref<1x128xf32, #tpu.memory_space<vmem>>, vector<1x128xf32>
    %136 = vector.broadcast %135 : vector<1x128xf32> to vector<4x128xf32>
    %137 = arith.addf %134, %136 : vector<4x128xf32>
    %c0_52 = arith.constant 0 : index
    %c0_53 = arith.constant 0 : index
    %138 = vector.load %arg11[%c0_52, %c0_53] : memref<4x128xf32, #tpu.memory_space<vmem>>, vector<4x128xf32>
    tpu.vector_store %arg11[%c0_52, %c0_53], %137 {strides = array<i32>} : memref<4x128xf32, #tpu.memory_space<vmem>>, vector<4x128xf32>,
    return
  }
}

</mosaic_0001>

<bundles_post_ra>
// kernel: coupled_discriminators.1
= control target key start
LH: loop header
LB: loop body
LE: loop exit
PB: predicated region body
PF: predicated region fallthrough
CT: control target
= control target key end

     0   :  { %v2274_v0 = vmov 0   ;;  %vm152_vm0 = vcmask 523264   ;;  %v2275_v34 = vmov 0.0   ;;  %vm2276_vm1 = vmmov 0   ;;  %s3147_s1 = inlined_call_operand.vmem [shape: bf16[192,128], index: 1, kind: input, shape index: {}]   ;;  %s3148_s0 = inlined_call_operand.vmem [shape: f32[4,1152], index: 0, kind: input, shape index: {}]   ;;  %s3149_s3 = inlined_call_operand.vmem [shape: bf16[384,128], index: 3, kind: input, shape index: {}]   ;;  %s3150_s2 = inlined_call_operand.vmem [shape: f32[1,128], index: 2, kind: input, shape index: {}]   ;;  %s3151_s5 = inlined_call_operand.vmem [shape: bf16[384,128], index: 5, kind: input, shape index: {}]   ;;  %s3152_s4 = inlined_call_operand.vmem [shape: f32[1,128], index: 4, kind: input, shape index: {}]   ;;  %s3153_s7 = inlined_call_operand.vmem [shape: bf16[256,128], index: 7, kind: input, shape index: {}]   ;;  %s3154_s9 = inlined_call_operand.vmem [shape: bf16[128,128], index: 9, kind: input, shape index: {}]   ;;  %s3155_s6 = inlined_call_operand.vmem [shape: f32[1,128], index: 6, kind: input, shape index: {}]   ;;  %s3156_s8 = inlined_call_operand.vmem [shape: f32[1,128], index: 8, kind: input, shape index: {}]   ;;  %s3157_s10 = inlined_call_operand.vmem [shape: f32[1,128], index: 10, kind: input, shape index: {}]   ;;  %s3158_s11 = inlined_call_operand.vmem [shape: f32[4,128], index: 11, kind: output, shape index: {}]  }
   0x1   :  { %156 = vmatprep.subr.bf16.mxu0 %v2274_v0  ;;  %203 = vmatprep.subr.bf16.mxu1 %v2274_v0  ;;  %v2343_v1 = vld [vmem:[%s3147_s1 + $0x38] sm:$0xff]   ;;  %v2350_v2 = vld [vmem:[%s3147_s1 + $0x30] sm:$0xff]   ;;  %v2359_v3 = vld [vmem:[%s3147_s1 + $0x28] sm:$0xff]  }
   0x2   :  { %157 = vmatpush1.bf16.msra.mxu0 %v2343_v1  ;;  %204 = vmatpush1.bf16.msra.mxu1 %v2343_v1  ;;  %v2368_v4 = vld [vmem:[%s3147_s1 + $0x20] sm:$0xff]   ;;  %v40_v6 = vld [vmem:[%s3148_s0 + $0x8] sm:$0xff]  ;;  %v2385_v9 = vld [vmem:[%s3147_s1 + $0x18] sm:$0xff]  }
   0x3   :  { %158 = vmatprep.subr.bf16.mxu0 %v2274_v0  ;;  %205 = vmatprep.subr.bf16.mxu1 %v2274_v0  ;;  %v39_v5 = vld [vmem:[%s3148_s0] sm:$0xff]  ;;  %v2378_v8 = vpack.c.bf16 %v40_v6, %v40_v6  ;;  %v2397_v11 = vld [vmem:[%s3147_s1 + $0x10] sm:$0xff]   ;;  %v2406_v12 = vld [vmem:[%s3147_s1 + $0x8] sm:$0xff]   ;;  %v245_v18 = vcombine.high %v40_v6, %v40_v6 }
   0x4   :  { %v70_v7 = vcombine.high %v39_v5, %v39_v5  ;;  %v2415_v13 = vld [vmem:[%s3147_s1] sm:$0xff]   ;;  %v2424_v14 = vld [vmem:[%s3147_s1 + $0x58] sm:$0xff]   ;;  %v2433_v15 = vld [vmem:[%s3147_s1 + $0x50] sm:$0xff]   ;;  %v72_v19 = vpack.c.bf16 %v39_v5, %v39_v5 }
   0x5   :  { %1742 = vmatprep.mubr.msk.bf16.mxu1 %vm152_vm0, %v2378_v8  ;;  %v2442_v16 = vld [vmem:[%s3147_s1 + $0x48] sm:$0xff]   ;;  %v2451_v17 = vld [vmem:[%s3147_s1 + $0x40] sm:$0xff]   ;;  %v41_v20 = vld [vmem:[%s3148_s0 + $0x10] sm:$0xff]  ;;  %v247_v21 = vpack.c.bf16 %v245_v18, %v245_v18 }
   0x6   :  { %159 = vmatpush1.bf16.msra.mxu0 %v2350_v2  ;;  %206 = vmatpush1.bf16.msra.mxu1 %v2350_v2  ;;  %v73_v10 = vpack.c.bf16 %v70_v7, %v70_v7  ;;  %v2462_v22 = vpack.c.bf16 %v41_v20, %v41_v20  ;;  %v340_v23 = vcombine.high %v41_v20, %v41_v20  ;;  %v42_v24 = vld [vmem:[%s3148_s0 + $0x18] sm:$0xff]  ;;  %v43_v28 = vld [vmem:[%s3148_s0 + $0x20] sm:$0xf]  ;;  %v2644_v35 = vld [vmem:[%s3149_s3 + $0x70] sm:$0xff]  }
   0x7   :  { %160 = vmatprep.subr.bf16.mxu0 %v2274_v0  ;;  %207 = vmatprep.subr.bf16.mxu1 %v2274_v0  ;;  %v2518_v26 = vpack.c.bf16 %v42_v24, %v42_v24  ;;  %v435_v27 = vcombine.high %v42_v24, %v42_v24  ;;  %v483_v30 = vpack.c.bf16 %v43_v28, %v43_v28  ;;  %v2625_v31 = vld [vmem:[%s3149_s3 + $0x78] sm:$0xff]   ;;  %v2652_v36 = vld [vmem:[%s3149_s3 + $0xb0] sm:$0xff]   ;;  %v2664_v38 = vld [vmem:[%s3149_s3 + $0x68] sm:$0xff]  }
   0x8   :  { %1741 = vmatprep.mubr.msk.bf16.mxu0 %vm152_vm0, %v73_v10  ;;  %v342_v25 = vpack.c.bf16 %v340_v23, %v340_v23  ;;  %v2632_v32 = vld [vmem:[%s3149_s3 + $0xb8] sm:$0xff]   ;;  %v2657_v37 = vld [vmem:[%s3149_s3 + $0x30] sm:$0xff]   ;;  %v2673_v39 = vld [vmem:[%s3149_s3 + $0xa8] sm:$0xff]  }
   0x9   :  { %v437_v29 = vpack.c.bf16 %v435_v27, %v435_v27  ;;  %v2637_v33 = vld [vmem:[%s3149_s3 + $0x38] sm:$0xff]   ;;  %v2678_v40 = vld [vmem:[%s3149_s3 + $0x28] sm:$0xff]   ;;  %v2685_v41 = vld [vmem:[%s3149_s3 + $0x60] sm:$0xff]  }
   0xa   :  { %161 = vmatpush1.bf16.msra.mxu0 %v2359_v3  ;;  %208 = vmatpush1.bf16.msra.mxu1 %v2359_v3  ;;  %v2692_v42 = vld [vmem:[%s3149_s3 + $0xa0] sm:$0xff]   ;;  %v2704_v44 = vld [vmem:[%s3149_s3 + $0x58] sm:$0xff]   ;;  %v2723_v47 = vld [vmem:[%s3149_s3 + $0x50] sm:$0xff]  }
   0xb   :  { %162 = vmatprep.subr.bf16.mxu0 %v2274_v0  ;;  %209 = vmatprep.subr.bf16.mxu1 %v2274_v0  ;;  %v2697_v43 = vld [vmem:[%s3149_s3 + $0x20] sm:$0xff]   ;;  %v2711_v45 = vld [vmem:[%s3149_s3 + $0x98] sm:$0xff]   ;;  %v2730_v48 = vld [vmem:[%s3149_s3 + $0x90] sm:$0xff]  }
   0xc   :  { %v2716_v46 = vld [vmem:[%s3149_s3 + $0x18] sm:$0xff]   ;;  %v2735_v49 = vld [vmem:[%s3149_s3 + $0x10] sm:$0xff]   ;;  %v2742_v50 = vld [vmem:[%s3149_s3 + $0x48] sm:$0xff]  }
   0xd   :  { %v2749_v51 = vld [vmem:[%s3149_s3 + $0x88] sm:$0xff]   ;;  %v2761_v53 = vld [vmem:[%s3149_s3 + $0x40] sm:$0xff]  }
   0xe   :  { %163 = vmatpush1.bf16.msra.mxu0 %v2368_v4  ;;  %210 = vmatpush1.bf16.msra.mxu1 %v2368_v4  ;;  %v2754_v52 = vld [vmem:[%s3149_s3 + $0x8] sm:$0xff]   ;;  %v2768_v54 = vld [vmem:[%s3149_s3 + $0x80] sm:$0xff]  }
   0xf   :  { %164 = vmatprep.subr.bf16.mxu0 %v2274_v0  ;;  %211 = vmatprep.subr.bf16.mxu1 %v2274_v0  ;;  %v2773_v55 = vld [vmem:[%s3149_s3] sm:$0xff]  }
  0x10   :  { %v2784_v56 = vld [vmem:[%s3150_s2] ss:$0 sm:$0xff] }
  0x12   :  { %165 = vmatpush1.bf16.msra.mxu0 %v2385_v9  ;;  %212 = vmatpush1.bf16.msra.mxu1 %v2385_v9 }
  0x13   :  { %166 = vmatprep.subr.bf16.mxu0 %v2274_v0  ;;  %213 = vmatprep.subr.bf16.mxu1 %v2274_v0 }
  0x16   :  { %167 = vmatpush1.bf16.msra.mxu0 %v2397_v11  ;;  %214 = vmatpush1.bf16.msra.mxu1 %v2397_v11 }
  0x17   :  { %168 = vmatprep.subr.bf16.mxu0 %v2274_v0  ;;  %215 = vmatprep.subr.bf16.mxu1 %v2274_v0 }
  0x1a   :  { %169 = vmatpush1.bf16.msra.mxu0 %v2406_v12  ;;  %216 = vmatpush1.bf16.msra.mxu1 %v2406_v12 }
  0x1b   :  { %170 = vmatprep.subr.bf16.mxu0 %v2274_v0  ;;  %217 = vmatprep.subr.bf16.mxu1 %v2274_v0 }
  0x1e   :  { %171 = vmatpush1.bf16.msra.mxu0 %v2415_v13  ;;  %218 = vmatpush1.bf16.msra.mxu1 %v2415_v13 }
  0x1f   :  { %180 = vmatprep.subr.bf16.mxu0 %v2274_v0  ;;  %227 = vmatprep.subr.bf16.mxu1 %v2274_v0 }
  0x22   :  { %181 = vmatpush2.bf16.msra.mxu0 %v2424_v14  ;;  %228 = vmatpush2.bf16.msra.mxu1 %v2424_v14 }
  0x23   :  { %182 = vmatprep.subr.bf16.mxu0 %v2274_v0  ;;  %229 = vmatprep.subr.bf16.mxu1 %v2274_v0 }
  0x26   :  { %183 = vmatpush2.bf16.msra.mxu0 %v2433_v15  ;;  %230 = vmatpush2.bf16.msra.mxu1 %v2433_v15 }
  0x27   :  { %184 = vmatprep.subr.bf16.mxu0 %v2274_v0  ;;  %231 = vmatprep.subr.bf16.mxu1 %v2274_v0 }
  0x2a   :  { %185 = vmatpush2.bf16.msra.mxu0 %v2442_v16  ;;  %232 = vmatpush2.bf16.msra.mxu1 %v2442_v16 }
  0x2b   :  { %186 = vmatprep.subr.bf16.mxu0 %v2274_v0  ;;  %233 = vmatprep.subr.bf16.mxu1 %v2274_v0 }
  0x2e   :  { %187 = vmatpush2.bf16.msra.mxu0 %v2451_v17  ;;  %234 = vmatpush2.bf16.msra.mxu1 %v2451_v17 }
  0x2f   :  { %251 = vmatprep.subr.bf16.mxu0 %v2274_v0  ;;  %298 = vmatprep.subr.bf16.mxu1 %v2274_v0 }
  0x31   :  { %189 = vmatmul.mubr.bf16.vlgmr.msra.gmra.mxu0 %v72_v19  ;;  %236 = vmatmul.mubr.bf16.vlgmr.msra.gmra.mxu1 %v73_v10 }
  0x32   :  { %252 = vmatpush1.bf16.msra.mxu0 %v2343_v1  ;;  %299 = vmatpush1.bf16.msra.mxu1 %v2343_v1 }
  0x33   :  { %253 = vmatprep.subr.bf16.mxu0 %v2274_v0  ;;  %300 = vmatprep.subr.bf16.mxu1 %v2274_v0 }
  0x34   :  { %1743 = vmatprep.mubr.msk.bf16.mxu0 %vm152_vm0, %v247_v21  ;;  %1744 = vmatprep.mubr.msk.bf16.mxu1 %vm152_vm0, %v2462_v22 }
  0x36   :  { %254 = vmatpush1.bf16.msra.mxu0 %v2350_v2  ;;  %301 = vmatpush1.bf16.msra.mxu1 %v2350_v2 }
  0x37   :  { %255 = vmatprep.subr.bf16.mxu0 %v2274_v0  ;;  %302 = vmatprep.subr.bf16.mxu1 %v2274_v0 }
  0x3a   :  { %256 = vmatpush1.bf16.msra.mxu0 %v2359_v3  ;;  %303 = vmatpush1.bf16.msra.mxu1 %v2359_v3 }
  0x3b   :  { %257 = vmatprep.subr.bf16.mxu0 %v2274_v0  ;;  %304 = vmatprep.subr.bf16.mxu1 %v2274_v0 }
  0x3e   :  { %258 = vmatpush1.bf16.msra.mxu0 %v2368_v4  ;;  %305 = vmatpush1.bf16.msra.mxu1 %v2368_v4 }
  0x3f   :  { %259 = vmatprep.subr.bf16.mxu0 %v2274_v0  ;;  %306 = vmatprep.subr.bf16.mxu1 %v2274_v0 }
  0x42   :  { %260 = vmatpush1.bf16.msra.mxu0 %v2385_v9  ;;  %307 = vmatpush1.bf16.msra.mxu1 %v2385_v9 }
  0x43   :  { %261 = vmatprep.subr.bf16.mxu0 %v2274_v0  ;;  %308 = vmatprep.subr.bf16.mxu1 %v2274_v0 }
  0x46   :  { %262 = vmatpush1.bf16.msra.mxu0 %v2397_v11  ;;  %309 = vmatpush1.bf16.msra.mxu1 %v2397_v11 }
  0x47   :  { %263 = vmatprep.subr.bf16.mxu0 %v2274_v0  ;;  %310 = vmatprep.subr.bf16.mxu1 %v2274_v0 }
  0x4a   :  { %264 = vmatpush1.bf16.msra.mxu0 %v2406_v12  ;;  %311 = vmatpush1.bf16.msra.mxu1 %v2406_v12 }
  0x4b   :  { %265 = vmatprep.subr.bf16.mxu0 %v2274_v0  ;;  %312 = vmatprep.subr.bf16.mxu1 %v2274_v0 }
  0x4e   :  { %266 = vmatpush1.bf16.msra.mxu0 %v2415_v13  ;;  %313 = vmatpush1.bf16.msra.mxu1 %v2415_v13 }
  0x4f   :  { %275 = vmatprep.subr.bf16.mxu0 %v2274_v0  ;;  %322 = vmatprep.subr.bf16.mxu1 %v2274_v0 }
  0x52   :  { %276 = vmatpush2.bf16.msra.mxu0 %v2424_v14  ;;  %323 = vmatpush2.bf16.msra.mxu1 %v2424_v14 }
  0x53   :  { %277 = vmatprep.subr.bf16.mxu0 %v2274_v0  ;;  %324 = vmatprep.subr.bf16.mxu1 %v2274_v0 }
  0x56   :  { %278 = vmatpush2.bf16.msra.mxu0 %v2433_v15  ;;  %325 = vmatpush2.bf16.msra.mxu1 %v2433_v15 }
  0x57   :  { %279 = vmatprep.subr.bf16.mxu0 %v2274_v0  ;;  %326 = vmatprep.subr.bf16.mxu1 %v2274_v0 }
  0x5a   :  { %280 = vmatpush2.bf16.msra.mxu0 %v2442_v16  ;;  %327 = vmatpush2.bf16.msra.mxu1 %v2442_v16 }
  0x5b   :  { %281 = vmatprep.subr.bf16.mxu0 %v2274_v0  ;;  %328 = vmatprep.subr.bf16.mxu1 %v2274_v0 }
  0x5e   :  { %282 = vmatpush2.bf16.msra.mxu0 %v2451_v17  ;;  %329 = vmatpush2.bf16.msra.mxu1 %v2451_v17 }
  0x5f   :  { %346 = vmatprep.subr.bf16.mxu0 %v2274_v0  ;;  %393 = vmatprep.subr.bf16.mxu1 %v2274_v0 }
  0x61   :  { %284 = vmatmul.mubr.bf16.vlgmr.msra.gmra.mxu0 %v2378_v8  ;;  %331 = vmatmul.mubr.bf16.vlgmr.msra.gmra.mxu1 %v247_v21 }
  0x62   :  { %347 = vmatpush1.bf16.msra.mxu0 %v2343_v1  ;;  %394 = vmatpush1.bf16.msra.mxu1 %v2343_v1 }
  0x63   :  { %348 = vmatprep.subr.bf16.mxu0 %v2274_v0  ;;  %395 = vmatprep.subr.bf16.mxu1 %v2274_v0 }
  0x64   :  { %1745 = vmatprep.mubr.msk.bf16.mxu0 %vm152_vm0, %v342_v25  ;;  %1746 = vmatprep.mubr.msk.bf16.mxu1 %vm152_vm0, %v2518_v26 }
  0x66   :  { %349 = vmatpush1.bf16.msra.mxu0 %v2350_v2  ;;  %396 = vmatpush1.bf16.msra.mxu1 %v2350_v2 }
  0x67   :  { %350 = vmatprep.subr.bf16.mxu0 %v2274_v0  ;;  %397 = vmatprep.subr.bf16.mxu1 %v2274_v0 }
  0x6a   :  { %351 = vmatpush1.bf16.msra.mxu0 %v2359_v3  ;;  %398 = vmatpush1.bf16.msra.mxu1 %v2359_v3 }
  0x6b   :  { %352 = vmatprep.subr.bf16.mxu0 %v2274_v0  ;;  %399 = vmatprep.subr.bf16.mxu1 %v2274_v0 }
  0x6e   :  { %353 = vmatpush1.bf16.msra.mxu0 %v2368_v4  ;;  %400 = vmatpush1.bf16.msra.mxu1 %v2368_v4 }
  0x6f   :  { %354 = vmatprep.subr.bf16.mxu0 %v2274_v0  ;;  %401 = vmatprep.subr.bf16.mxu1 %v2274_v0 }
  0x72   :  { %355 = vmatpush1.bf16.msra.mxu0 %v2385_v9  ;;  %402 = vmatpush1.bf16.msra.mxu1 %v2385_v9 }
  0x73   :  { %356 = vmatprep.subr.bf16.mxu0 %v2274_v0  ;;  %403 = vmatprep.subr.bf16.mxu1 %v2274_v0 }
  0x76   :  { %357 = vmatpush1.bf16.msra.mxu0 %v2397_v11  ;;  %404 = vmatpush1.bf16.msra.mxu1 %v2397_v11 }
  0x77   :  { %358 = vmatprep.subr.bf16.mxu0 %v2274_v0  ;;  %405 = vmatprep.subr.bf16.mxu1 %v2274_v0 }
  0x7a   :  { %359 = vmatpush1.bf16.msra.mxu0 %v2406_v12  ;;  %406 = vmatpush1.bf16.msra.mxu1 %v2406_v12 }
  0x7b   :  { %360 = vmatprep.subr.bf16.mxu0 %v2274_v0  ;;  %407 = vmatprep.subr.bf16.mxu1 %v2274_v0 }
  0x7e   :  { %361 = vmatpush1.bf16.msra.mxu0 %v2415_v13  ;;  %408 = vmatpush1.bf16.msra.mxu1 %v2415_v13 }
  0x7f   :  { %370 = vmatprep.subr.bf16.mxu0 %v2274_v0  ;;  %417 = vmatprep.subr.bf16.mxu1 %v2274_v0 }
  0x82   :  { %371 = vmatpush2.bf16.msra.mxu0 %v2424_v14  ;;  %418 = vmatpush2.bf16.msra.mxu1 %v2424_v14 }
  0x83   :  { %372 = vmatprep.subr.bf16.mxu0 %v2274_v0  ;;  %419 = vmatprep.subr.bf16.mxu1 %v2274_v0 }
  0x86   :  { %373 = vmatpush2.bf16.msra.mxu0 %v2433_v15  ;;  %420 = vmatpush2.bf16.msra.mxu1 %v2433_v15 }
  0x87   :  { %374 = vmatprep.subr.bf16.mxu0 %v2274_v0  ;;  %421 = vmatprep.subr.bf16.mxu1 %v2274_v0 }
  0x8a   :  { %375 = vmatpush2.bf16.msra.mxu0 %v2442_v16  ;;  %422 = vmatpush2.bf16.msra.mxu1 %v2442_v16 }
  0x8b   :  { %376 = vmatprep.subr.bf16.mxu0 %v2274_v0  ;;  %423 = vmatprep.subr.bf16.mxu1 %v2274_v0 }
  0x8e   :  { %377 = vmatpush2.bf16.msra.mxu0 %v2451_v17  ;;  %424 = vmatpush2.bf16.msra.mxu1 %v2451_v17 }
  0x8f   :  { %441 = vmatprep.subr.bf16.mxu0 %v2274_v0  ;;  %487 = vmatprep.subr.bf16.mxu1 %v2274_v0 }
  0x91   :  { %379 = vmatmul.mubr.bf16.vlgmr.msra.gmra.mxu0 %v2462_v22  ;;  %426 = vmatmul.mubr.bf16.vlgmr.msra.gmra.mxu1 %v342_v25 }
  0x92   :  { %442 = vmatpush1.bf16.msra.mxu0 %v2343_v1  ;;  %488 = vmatpush1.bf16.msra.mxu1 %v2343_v1 }
  0x93   :  { %443 = vmatprep.subr.bf16.mxu0 %v2274_v0  ;;  %489 = vmatprep.subr.bf16.mxu1 %v2274_v0 }
  0x94   :  { %1747 = vmatprep.mubr.msk.bf16.mxu0 %vm152_vm0, %v437_v29  ;;  %1748 = vmatprep.mubr.msk.bf16.mxu1 %vm152_vm0, %v483_v30 }
  0x96   :  { %444 = vmatpush1.bf16.msra.mxu0 %v2350_v2  ;;  %490 = vmatpush1.bf16.msra.mxu1 %v2350_v2 }
  0x97   :  { %445 = vmatprep.subr.bf16.mxu0 %v2274_v0  ;;  %491 = vmatprep.subr.bf16.mxu1 %v2274_v0 }
  0x9a   :  { %446 = vmatpush1.bf16.msra.mxu0 %v2359_v3  ;;  %492 = vmatpush1.bf16.msra.mxu1 %v2359_v3 }
  0x9b   :  { %447 = vmatprep.subr.bf16.mxu0 %v2274_v0  ;;  %493 = vmatprep.subr.bf16.mxu1 %v2274_v0 }
  0x9e   :  { %448 = vmatpush1.bf16.msra.mxu0 %v2368_v4  ;;  %494 = vmatpush1.bf16.msra.mxu1 %v2368_v4 }
  0x9f   :  { %449 = vmatprep.subr.bf16.mxu0 %v2274_v0  ;;  %495 = vmatprep.subr.bf16.mxu1 %v2274_v0 }
  0xa2   :  { %450 = vmatpush1.bf16.msra.mxu0 %v2385_v9  ;;  %496 = vmatpush1.bf16.msra.mxu1 %v2385_v9  ;;  %v2277_v9 = vmov 0.0|0.0  }
  0xa3   :  { %451 = vmatprep.subr.bf16.mxu0 %v2274_v0  ;;  %497 = vmatprep.subr.bf16.mxu1 %v2274_v0 }
  0xa6   :  { %452 = vmatpush1.bf16.msra.mxu0 %v2397_v11  ;;  %498 = vmatpush1.bf16.msra.mxu1 %v2397_v11 }
  0xa7   :  { %453 = vmatprep.subr.bf16.mxu0 %v2274_v0  ;;  %499 = vmatprep.subr.bf16.mxu1 %v2274_v0 }
  0xaa   :  { %454 = vmatpush1.bf16.msra.mxu0 %v2406_v12  ;;  %500 = vmatpush1.bf16.msra.mxu1 %v2406_v12 }
  0xab   :  { %455 = vmatprep.subr.bf16.mxu0 %v2274_v0  ;;  %501 = vmatprep.subr.bf16.mxu1 %v2274_v0 }
  0xae   :  { %456 = vmatpush1.bf16.msra.mxu0 %v2415_v13  ;;  %502 = vmatpush1.bf16.msra.mxu1 %v2415_v13 }
  0xaf   :  { %465 = vmatprep.subr.bf16.mxu0 %v2274_v0  ;;  %511 = vmatprep.subr.bf16.mxu1 %v2274_v0 }
  0xb2   :  { %466 = vmatpush2.bf16.msra.mxu0 %v2424_v14  ;;  %512 = vmatpush2.bf16.msra.mxu1 %v2424_v14 }
  0xb3   :  { %467 = vmatprep.subr.bf16.mxu0 %v2274_v0  ;;  %513 = vmatprep.subr.bf16.mxu1 %v2274_v0 }
  0xb6   :  { %468 = vmatpush2.bf16.msra.mxu0 %v2433_v15  ;;  %514 = vmatpush2.bf16.msra.mxu1 %v2433_v15 }
  0xb7   :  { %469 = vmatprep.subr.bf16.mxu0 %v2274_v0  ;;  %515 = vmatprep.subr.bf16.mxu1 %v2274_v0 }
  0xba   :  { %470 = vmatpush2.bf16.msra.mxu0 %v2442_v16  ;;  %516 = vmatpush2.bf16.msra.mxu1 %v2442_v16 }
  0xbb   :  { %471 = vmatprep.subr.bf16.mxu0 %v2274_v0  ;;  %517 = vmatprep.subr.bf16.mxu1 %v2274_v0 }
  0xbe   :  { %472 = vmatpush2.bf16.msra.mxu0 %v2451_v17  ;;  %518 = vmatpush2.bf16.msra.mxu1 %v2451_v17 }
  0xbf   :  { %2042 = vmatprep.subr.bf16.mxu1 %v2275_v34  ;;  %1825 = vmatprep.subr.bf16.mxu0 %v2625_v31 }
  0xc1   :  { %474 = vmatmul.mubr.bf16.vlgmr.msra.gmra.mxu0 %v2518_v26  ;;  %520 = vmatmul.mubr.bf16.vlgmr.msra.gmra.mxu1 %v437_v29 }
  0xc2   :  { %2043 = vmatpush3.bf16.msra.mxu1 %v2632_v32  ;;  %1826 = vmatpush3.bf16.msra.mxu0 %v2637_v33 }
  0xc3   :  { %2044 = vmatprep.subr.bf16.mxu1 %v2275_v34  ;;  %1827 = vmatprep.subr.bf16.mxu0 %v2644_v35 }
  0xc4   :  { %2058 = vmatprep.mubr.msk.bf16.mxu1 %vm2276_vm1, %v2275_v34 }
  0xc6   :  { %2045 = vmatpush3.bf16.msra.mxu1 %v2652_v36  ;;  %1828 = vmatpush3.bf16.msra.mxu0 %v2657_v37 }
  0xc7   :  { %2046 = vmatprep.subr.bf16.mxu1 %v2275_v34  ;;  %1829 = vmatprep.subr.bf16.mxu0 %v2664_v38 }
  0xca   :  { %2047 = vmatpush3.bf16.msra.mxu1 %v2673_v39  ;;  %1830 = vmatpush3.bf16.msra.mxu0 %v2678_v40 }
  0xcb   :  { %2048 = vmatprep.subr.bf16.mxu1 %v2275_v34  ;;  %1831 = vmatprep.subr.bf16.mxu0 %v2685_v41 }
  0xce   :  { %2049 = vmatpush3.bf16.msra.mxu1 %v2692_v42  ;;  %1832 = vmatpush3.bf16.msra.mxu0 %v2697_v43 }
  0xcf   :  { %2050 = vmatprep.subr.bf16.mxu1 %v2275_v34  ;;  %1833 = vmatprep.subr.bf16.mxu0 %v2704_v44 }
  0xd2   :  { %2051 = vmatpush3.bf16.msra.mxu1 %v2711_v45  ;;  %1834 = vmatpush3.bf16.msra.mxu0 %v2716_v46 }
  0xd3   :  { %2052 = vmatprep.subr.bf16.mxu1 %v2275_v34  ;;  %1835 = vmatprep.subr.bf16.mxu0 %v2723_v47 }
  0xd6   :  { %2053 = vmatpush3.bf16.msra.mxu1 %v2730_v48  ;;  %1836 = vmatpush3.bf16.msra.mxu0 %v2735_v49 }
  0xd7   :  { %2054 = vmatprep.subr.bf16.mxu1 %v2275_v34  ;;  %1837 = vmatprep.subr.bf16.mxu0 %v2742_v50 }
  0xda   :  { %2055 = vmatpush3.bf16.msra.mxu1 %v2749_v51  ;;  %1838 = vmatpush3.bf16.msra.mxu0 %v2754_v52 }
  0xdb   :  { %2056 = vmatprep.subr.bf16.mxu1 %v2275_v34  ;;  %1839 = vmatprep.subr.bf16.mxu0 %v2761_v53 }
  0xde   :  { %2057 = vmatpush3.bf16.msra.mxu1 %v2768_v54  ;;  %1840 = vmatpush3.bf16.msra.mxu0 %v2773_v55 }
  0xdf   :  { %2062 = vmatprep.subr.bf16.mxu1 %v2275_v34  ;;  %1856 = vmatprep.subr.bf16.mxu0 %v2625_v31 }
  0xf1   :  { %v190_v57 = vpop.f32.mrf.mxu0  ;;  %v237_v58 = vpop.f32.mrf.mxu1 }
  0xf2   :  { %v191_v59 = vadd.f32 %v2784_v56, %v190_v57  ;;  %v238_v60 = vadd.f32 %v2784_v56, %v237_v58 }
  0xf3   :  { %v192_v61 = vpop.f32.mrf.mxu0  ;;  %v239_v62 = vpop.f32.mrf.mxu1 }
  0xf4   :  { %v196_v63 = vmul.f32 0.2, %v191_v59  ;;  %v243_v0 = vmul.f32 0.2, %v238_v60 }
  0xf5   :  { %v193_v1 = vpop.f32.mrf.mxu0  ;;  %v240_v2 = vpop.f32.mrf.mxu1 }
  0xf6   :  { %v197_v3 = vmax.f32 %v191_v59, %v196_v63  ;;  %v244_v4 = vmax.f32 %v238_v60, %v243_v0 }
  0xf7   :  { %v194_v5 = vpop.f32.mrf.mxu0  ;;  %v241_v6 = vpop.f32.mrf.mxu1 }
  0xf8   :  { %v579_v7 = vpack.c.bf16 %v197_v3, %v197_v3  ;;  %v580_v8 = vpack.c.bf16 %v244_v4, %v244_v4  ;;  %v2234_v4 = vld [vmem:[%s3151_s5 + $0x60] sm:$0xff]  }
  0xf9   :  { %v2959_v5 = vld [vmem:[%s3151_s5 + $0xa0] sm:$0xff]  }
  0xfa   :  { %763 = vmatprep.mubr.bf16.mxu0 %v579_v7  ;;  %2059 = vmatmul.mubr.bf16.vlgmr.msra.gmra.mxu1 %v580_v8  ;;  %v2235_v6 = vld [vmem:[%s3151_s5 + $0x20] sm:$0xff]   ;;  %v2237_v7 = vld [vmem:[%s3151_s5 + $0x58] sm:$0xff]  }
  0xfb   :  { %764 = vmatmul.mubr.bf16.vlgmr.msra.gmra.mxu0 %v2277_v9  ;;  %2063 = vmatpush3.bf16.msra.mxu1 %v2632_v32 }
  0xfc   :  { %1857 = vmatpush3.bf16.msra.mxu0 %v2637_v33  ;;  %2064 = vmatprep.subr.bf16.mxu1 %v2275_v34 }
  0xfd   :  { %1858 = vmatprep.subr.bf16.mxu0 %v2644_v35  ;;  %2078 = vmatprep.mubr.msk.bf16.mxu1 %vm2276_vm1, %v2275_v34 }
  0xff   :  { %2065 = vmatpush3.bf16.msra.mxu1 %v2652_v36 }
 0x100   :  { %1859 = vmatpush3.bf16.msra.mxu0 %v2657_v37  ;;  %2066 = vmatprep.subr.bf16.mxu1 %v2275_v34 }
 0x101   :  { %1860 = vmatprep.subr.bf16.mxu0 %v2664_v38 }
 0x103   :  { %2067 = vmatpush3.bf16.msra.mxu1 %v2673_v39 }
 0x104   :  { %1861 = vmatpush3.bf16.msra.mxu0 %v2678_v40  ;;  %2068 = vmatprep.subr.bf16.mxu1 %v2275_v34 }
 0x105   :  { %1862 = vmatprep.subr.bf16.mxu0 %v2685_v41 }
 0x107   :  { %2069 = vmatpush3.bf16.msra.mxu1 %v2692_v42 }
 0x108   :  { %1863 = vmatpush3.bf16.msra.mxu0 %v2697_v43  ;;  %2070 = vmatprep.subr.bf16.mxu1 %v2275_v34 }
 0x109   :  { %1864 = vmatprep.subr.bf16.mxu0 %v2704_v44 }
 0x10b   :  { %2071 = vmatpush3.bf16.msra.mxu1 %v2711_v45 }
 0x10c   :  { %1865 = vmatpush3.bf16.msra.mxu0 %v2716_v46  ;;  %2072 = vmatprep.subr.bf16.mxu1 %v2275_v34 }
 0x10d   :  { %1866 = vmatprep.subr.bf16.mxu0 %v2723_v47 }
 0x10f   :  { %2073 = vmatpush3.bf16.msra.mxu1 %v2730_v48 }
 0x110   :  { %1867 = vmatpush3.bf16.msra.mxu0 %v2735_v49  ;;  %2074 = vmatprep.subr.bf16.mxu1 %v2275_v34 }
 0x111   :  { %1868 = vmatprep.subr.bf16.mxu0 %v2742_v50 }
 0x113   :  { %2075 = vmatpush3.bf16.msra.mxu1 %v2749_v51 }
 0x114   :  { %1869 = vmatpush3.bf16.msra.mxu0 %v2754_v52  ;;  %2076 = vmatprep.subr.bf16.mxu1 %v2275_v34 }
 0x115   :  { %1870 = vmatprep.subr.bf16.mxu0 %v2761_v53 }
 0x117   :  { %2077 = vmatpush3.bf16.msra.mxu1 %v2768_v54 }
 0x118   :  { %1871 = vmatpush3.bf16.msra.mxu0 %v2773_v55  ;;  %2082 = vmatprep.subr.bf16.mxu1 %v2275_v34 }
 0x119   :  { %1887 = vmatprep.subr.bf16.mxu0 %v2625_v31 }
 0x121   :  { %v285_v10 = vpop.f32.mrf.mxu0  ;;  %v332_v11 = vpop.f32.mrf.mxu1 }
 0x122   :  { %v286_v12 = vadd.f32 %v2784_v56, %v285_v10  ;;  %v333_v13 = vadd.f32 %v2784_v56, %v332_v11  ;;  %v2238_v10 = vld [vmem:[%s3151_s5 + $0x18] sm:$0xff]   ;;  %v2240_v11 = vld [vmem:[%s3151_s5 + $0x50] sm:$0xff]  }
 0x123   :  { %v287_v14 = vpop.f32.mrf.mxu0  ;;  %v334_v15 = vpop.f32.mrf.mxu1 }
 0x124   :  { %v291_v16 = vmul.f32 0.2, %v286_v12  ;;  %v338_v17 = vmul.f32 0.2, %v333_v13  ;;  %v2243_v14 = vld [vmem:[%s3151_s5 + $0x48] sm:$0xff]  }
 0x125   :  { %v288_v18 = vpop.f32.mrf.mxu0  ;;  %v335_v19 = vpop.f32.mrf.mxu1  ;;  %v2999_v15 = vld [vmem:[%s3151_s5 + $0x88] sm:$0xff]  }
 0x126   :  { %v292_v20 = vmax.f32 %v286_v12, %v291_v16  ;;  %v339_v21 = vmax.f32 %v333_v13, %v338_v17  ;;  %v2986_v12 = vld [vmem:[%s3151_s5 + $0x90] sm:$0xff]   ;;  %v2244_v16 = vld [vmem:[%s3151_s5 + $0x8] sm:$0xff]   ;;  %v2246_v17 = vld [vmem:[%s3151_s5 + $0x40] sm:$0xff]  }
 0x127   :  { %v289_v22 = vpop.f32.mrf.mxu0  ;;  %v336_v23 = vpop.f32.mrf.mxu1  ;;  %v2241_v13 = vld [vmem:[%s3151_s5 + $0x10] sm:$0xff]   ;;  %v3012_v18 = vld [vmem:[%s3151_s5 + $0x80] sm:$0xff]  }
 0x128   :  { %v813_v24 = vpack.c.bf16 %v292_v20, %v292_v20  ;;  %v814_v25 = vpack.c.bf16 %v339_v21, %v339_v21  ;;  %v2247_v19 = vld [vmem:[%s3151_s5] sm:$0xff]  }
 0x129   :  { %v3024_v23 = vld [vmem:[%s3152_s4] ss:$0 sm:$0xff] }
 0x12a   :  { %847 = vmatprep.mubr.bf16.mxu0 %v813_v24  ;;  %2079 = vmatmul.mubr.bf16.vlgmr.msra.gmra.mxu1 %v814_v25 }
 0x12b   :  { %848 = vmatmul.mubr.bf16.vlgmr.msra.gmra.mxu0 %v580_v8  ;;  %2083 = vmatpush3.bf16.msra.mxu1 %v2632_v32  ;;  %v2973_v8 = vld [vmem:[%s3151_s5 + $0x98] sm:$0xff]  }
 0x12c   :  { %1888 = vmatpush3.bf16.msra.mxu0 %v2637_v33  ;;  %2084 = vmatprep.subr.bf16.mxu1 %v2275_v34 }
 0x12d   :  { %1889 = vmatprep.subr.bf16.mxu0 %v2644_v35  ;;  %2098 = vmatprep.mubr.msk.bf16.mxu1 %vm2276_vm1, %v2275_v34 }
 0x12f   :  { %2085 = vmatpush3.bf16.msra.mxu1 %v2652_v36 }
 0x130   :  { %1890 = vmatpush3.bf16.msra.mxu0 %v2657_v37  ;;  %2086 = vmatprep.subr.bf16.mxu1 %v2275_v34 }
 0x131   :  { %1891 = vmatprep.subr.bf16.mxu0 %v2664_v38 }
 0x133   :  { %2087 = vmatpush3.bf16.msra.mxu1 %v2673_v39 }
 0x134   :  { %1892 = vmatpush3.bf16.msra.mxu0 %v2678_v40  ;;  %2088 = vmatprep.subr.bf16.mxu1 %v2275_v34 }
 0x135   :  { %1893 = vmatprep.subr.bf16.mxu0 %v2685_v41 }
 0x137   :  { %2089 = vmatpush3.bf16.msra.mxu1 %v2692_v42 }
 0x138   :  { %1894 = vmatpush3.bf16.msra.mxu0 %v2697_v43  ;;  %2090 = vmatprep.subr.bf16.mxu1 %v2275_v34 }
 0x139   :  { %1895 = vmatprep.subr.bf16.mxu0 %v2704_v44 }
 0x13b   :  { %2091 = vmatpush3.bf16.msra.mxu1 %v2711_v45 }
 0x13c   :  { %1896 = vmatpush3.bf16.msra.mxu0 %v2716_v46  ;;  %2092 = vmatprep.subr.bf16.mxu1 %v2275_v34 }
 0x13d   :  { %1897 = vmatprep.subr.bf16.mxu0 %v2723_v47 }
 0x13f   :  { %2093 = vmatpush3.bf16.msra.mxu1 %v2730_v48 }
 0x140   :  { %1898 = vmatpush3.bf16.msra.mxu0 %v2735_v49  ;;  %2094 = vmatprep.subr.bf16.mxu1 %v2275_v34 }
 0x141   :  { %1899 = vmatprep.subr.bf16.mxu0 %v2742_v50 }
 0x143   :  { %2095 = vmatpush3.bf16.msra.mxu1 %v2749_v51 }
 0x144   :  { %1900 = vmatpush3.bf16.msra.mxu0 %v2754_v52  ;;  %2096 = vmatprep.subr.bf16.mxu1 %v2275_v34 }
 0x145   :  { %1901 = vmatprep.subr.bf16.mxu0 %v2761_v53 }
 0x147   :  { %2097 = vmatpush3.bf16.msra.mxu1 %v2768_v54 }
 0x148   :  { %1902 = vmatpush3.bf16.msra.mxu0 %v2773_v55  ;;  %2102 = vmatprep.subr.bf16.mxu1 %v2275_v34 }
 0x149   :  { %1918 = vmatprep.subr.bf16.mxu0 %v2625_v31  ;;  %v2894_v31 = vld [vmem:[%s3151_s5 + $0x78] sm:$0xff]  }
 0x151   :  { %v380_v26 = vpop.f32.mrf.mxu0  ;;  %v427_v27 = vpop.f32.mrf.mxu1 }
 0x152   :  { %v381_v28 = vadd.f32 %v2784_v56, %v380_v26  ;;  %v428_v29 = vadd.f32 %v2784_v56, %v427_v27 }
 0x153   :  { %v382_v30 = vpop.f32.mrf.mxu0  ;;  %v429_v57 = vpop.f32.mrf.mxu1 }
 0x154   :  { %v386_v58 = vmul.f32 0.2, %v381_v28  ;;  %v433_v59 = vmul.f32 0.2, %v428_v29 }
 0x155   :  { %v383_v60 = vpop.f32.mrf.mxu0  ;;  %v430_v61 = vpop.f32.mrf.mxu1 }
 0x156   :  { %v387_v62 = vmax.f32 %v381_v28, %v386_v58  ;;  %v434_v63 = vmax.f32 %v428_v29, %v433_v59 }
 0x157   :  { %v384_v0 = vpop.f32.mrf.mxu0  ;;  %v431_v1 = vpop.f32.mrf.mxu1 }
 0x158   :  { %v897_v2 = vpack.c.bf16 %v387_v62, %v387_v62  ;;  %v898_v3 = vpack.c.bf16 %v434_v63, %v434_v63 }
 0x15a   :  { %931 = vmatprep.mubr.bf16.mxu0 %v897_v2  ;;  %2099 = vmatmul.mubr.bf16.vlgmr.msra.gmra.mxu1 %v898_v3 }
 0x15b   :  { %932 = vmatmul.mubr.bf16.vlgmr.msra.gmra.mxu0 %v814_v25  ;;  %2103 = vmatpush3.bf16.msra.mxu1 %v2632_v32 }
 0x15c   :  { %1919 = vmatpush3.bf16.msra.mxu0 %v2637_v33  ;;  %2104 = vmatprep.subr.bf16.mxu1 %v2275_v34 }
 0x15d   :  { %1920 = vmatprep.subr.bf16.mxu0 %v2644_v35  ;;  %2118 = vmatprep.mubr.msk.bf16.mxu1 %vm2276_vm1, %v2275_v34 }
 0x15f   :  { %2105 = vmatpush3.bf16.msra.mxu1 %v2652_v36 }
 0x160   :  { %1921 = vmatpush3.bf16.msra.mxu0 %v2657_v37  ;;  %2106 = vmatprep.subr.bf16.mxu1 %v2275_v34 }
 0x161   :  { %1922 = vmatprep.subr.bf16.mxu0 %v2664_v38 }
 0x163   :  { %2107 = vmatpush3.bf16.msra.mxu1 %v2673_v39 }
 0x164   :  { %1923 = vmatpush3.bf16.msra.mxu0 %v2678_v40  ;;  %2108 = vmatprep.subr.bf16.mxu1 %v2275_v34 }
 0x165   :  { %1924 = vmatprep.subr.bf16.mxu0 %v2685_v41 }
 0x167   :  { %2109 = vmatpush3.bf16.msra.mxu1 %v2692_v42 }
 0x168   :  { %1925 = vmatpush3.bf16.msra.mxu0 %v2697_v43  ;;  %2110 = vmatprep.subr.bf16.mxu1 %v2275_v34 }
 0x169   :  { %1926 = vmatprep.subr.bf16.mxu0 %v2704_v44 }
 0x16b   :  { %2111 = vmatpush3.bf16.msra.mxu1 %v2711_v45 }
 0x16c   :  { %1927 = vmatpush3.bf16.msra.mxu0 %v2716_v46  ;;  %2112 = vmatprep.subr.bf16.mxu1 %v2275_v34 }
 0x16d   :  { %1928 = vmatprep.subr.bf16.mxu0 %v2723_v47  ;;  %v2905_v47 = vld [vmem:[%s3151_s5 + $0xb8] sm:$0xff]  }
 0x16f   :  { %2113 = vmatpush3.bf16.msra.mxu1 %v2730_v48 }
 0x170   :  { %1929 = vmatpush3.bf16.msra.mxu0 %v2735_v49  ;;  %2114 = vmatprep.subr.bf16.mxu1 %v2275_v34 }
 0x171   :  { %1930 = vmatprep.subr.bf16.mxu0 %v2742_v50  ;;  %v2910_v50 = vld [vmem:[%s3151_s5 + $0x38] sm:$0xff]  }
 0x173   :  { %2115 = vmatpush3.bf16.msra.mxu1 %v2749_v51  ;;  %v2915_v51 = vld [vmem:[%s3151_s5 + $0x70] sm:$0xff]  }
 0x174   :  { %1931 = vmatpush3.bf16.msra.mxu0 %v2754_v52  ;;  %2116 = vmatprep.subr.bf16.mxu1 %v2275_v34  ;;  %v2921_v52 = vld [vmem:[%s3151_s5 + $0xb0] sm:$0xff]  }
 0x175   :  { %1932 = vmatprep.subr.bf16.mxu0 %v2761_v53  ;;  %v2927_v53 = vld [vmem:[%s3151_s5 + $0x30] sm:$0xff]  }
 0x177   :  { %2117 = vmatpush3.bf16.msra.mxu1 %v2768_v54  ;;  %v2934_v54 = vld [vmem:[%s3151_s5 + $0x68] sm:$0xff]  }
 0x178   :  { %1933 = vmatpush3.bf16.msra.mxu0 %v2773_v55  ;;  %2122 = vmatprep.subr.bf16.mxu1 %v2275_v34  ;;  %v2942_v55 = vld [vmem:[%s3151_s5 + $0xa8] sm:$0xff]  }
 0x179   :  { %1949 = vmatprep.subr.bf16.mxu0 %v2894_v31 }
 0x181   :  { %v475_v32 = vpop.f32.mrf.mxu0  ;;  %v521_v33 = vpop.f32.mrf.mxu1 }
 0x182   :  { %v476_v35 = vadd.f32 %v2784_v56, %v475_v32  ;;  %v522_v36 = vadd.f32 %v2784_v56, %v521_v33  ;;  %v2948_v56 = vld [vmem:[%s3151_s5 + $0x28] sm:$0xff]  }
 0x183   :  { %v477_v37 = vpop.f32.mrf.mxu0  ;;  %v523_v38 = vpop.f32.mrf.mxu1 }
 0x184   :  { %v481_v39 = vmul.f32 0.2, %v476_v35  ;;  %v527_v40 = vmul.f32 0.2, %v522_v36 }
 0x185   :  { %v478_v41 = vpop.f32.mrf.mxu0  ;;  %v524_v42 = vpop.f32.mrf.mxu1 }
 0x186   :  { %v482_v43 = vmax.f32 %v476_v35, %v481_v39  ;;  %v528_v44 = vmax.f32 %v522_v36, %v527_v40 }
 0x187   :  { %v479_v45 = vpop.f32.mrf.mxu0  ;;  %v525_v46 = vpop.f32.mrf.mxu1 }
 0x188   :  { %v981_v48 = vpack.c.bf16 %v482_v43, %v482_v43  ;;  %v982_v49 = vpack.c.bf16 %v528_v44, %v528_v44 }
 0x18a   :  { %1015 = vmatprep.mubr.bf16.mxu0 %v981_v48  ;;  %2119 = vmatmul.mubr.bf16.vlgmr.msra.gmra.mxu1 %v982_v49 }
 0x18b   :  { %1016 = vmatmul.mubr.bf16.vlgmr.msra.gmra.mxu0 %v898_v3  ;;  %2123 = vmatpush3.bf16.msra.mxu1 %v2905_v47 }
 0x18c   :  { %1950 = vmatpush3.bf16.msra.mxu0 %v2910_v50  ;;  %2124 = vmatprep.subr.bf16.mxu1 %v2275_v34 }
 0x18d   :  { %1951 = vmatprep.subr.bf16.mxu0 %v2915_v51  ;;  %2138 = vmatprep.mubr.msk.bf16.mxu1 %vm2276_vm1, %v2275_v34 }
 0x18f   :  { %2125 = vmatpush3.bf16.msra.mxu1 %v2921_v52 }
 0x190   :  { %1952 = vmatpush3.bf16.msra.mxu0 %v2927_v53  ;;  %2126 = vmatprep.subr.bf16.mxu1 %v2275_v34 }
 0x191   :  { %1953 = vmatprep.subr.bf16.mxu0 %v2934_v54 }
 0x193   :  { %2127 = vmatpush3.bf16.msra.mxu1 %v2942_v55 }
 0x194   :  { %1954 = vmatpush3.bf16.msra.mxu0 %v2948_v56  ;;  %2128 = vmatprep.subr.bf16.mxu1 %v2275_v34 }
 0x195   :  { %1955 = vmatprep.subr.bf16.mxu0 %v2234_v4 }
 0x197   :  { %2129 = vmatpush3.bf16.msra.mxu1 %v2959_v5 }
 0x198   :  { %1956 = vmatpush3.bf16.msra.mxu0 %v2235_v6  ;;  %2130 = vmatprep.subr.bf16.mxu1 %v2275_v34 }
 0x199   :  { %1957 = vmatprep.subr.bf16.mxu0 %v2237_v7 }
 0x19b   :  { %2131 = vmatpush3.bf16.msra.mxu1 %v2973_v8 }
 0x19c   :  { %1958 = vmatpush3.bf16.msra.mxu0 %v2238_v10  ;;  %2132 = vmatprep.subr.bf16.mxu1 %v2275_v34 }
 0x19d   :  { %1959 = vmatprep.subr.bf16.mxu0 %v2240_v11 }
 0x19f   :  { %2133 = vmatpush3.bf16.msra.mxu1 %v2986_v12 }
 0x1a0   :  { %1960 = vmatpush3.bf16.msra.mxu0 %v2241_v13  ;;  %2134 = vmatprep.subr.bf16.mxu1 %v2275_v34 }
 0x1a1   :  { %1961 = vmatprep.subr.bf16.mxu0 %v2243_v14 }
 0x1a3   :  { %2135 = vmatpush3.bf16.msra.mxu1 %v2999_v15 }
 0x1a4   :  { %1962 = vmatpush3.bf16.msra.mxu0 %v2244_v16  ;;  %2136 = vmatprep.subr.bf16.mxu1 %v2275_v34 }
 0x1a5   :  { %1963 = vmatprep.subr.bf16.mxu0 %v2246_v17 }
 0x1a7   :  { %2137 = vmatpush3.bf16.msra.mxu1 %v3012_v18 }
 0x1a8   :  { %1964 = vmatpush3.bf16.msra.mxu0 %v2247_v19  ;;  %2142 = vmatprep.subr.bf16.mxu1 %v2275_v34 }
 0x1a9   :  { %1980 = vmatprep.subr.bf16.mxu0 %v2894_v31 }
 0x1ba   :  { %v805_v20 = vpop.f32.mrf.mxu1 }
 0x1bb   :  { %v1841_v21 = vpop.f32.mrf.mxu0 }
 0x1bc   :  { %v2060_v22 = vpop.f32.mrf.mxu1 }
 0x1bd   :  { %v1842_v24 = vpop.f32.mrf.mxu0  ;;  %v2258_v22 = vld [vmem:[%s3153_s7 + $0x58] sm:$0xff]  }
 0x1be   :  { %v1843_v25 = vadd.f32 %v1842_v24, %v1841_v21  ;;  %v808_v26 = vpop.f32.mrf.mxu1  ;;  %v2257_v21 = vld [vmem:[%s3153_s7 + $0x20] sm:$0xff]   ;;  %v2260_v24 = vld [vmem:[%s3153_s7 + $0x50] sm:$0xff]  }
 0x1bf   :  { %v1844_v27 = vpop.f32.mrf.mxu0 }
 0x1c0   :  { %v766_v28 = vadd.f32 %v1843_v25, %v3024_v23  ;;  %v2061_v29 = vpop.f32.mrf.mxu1  ;;  %v2261_v25 = vld [vmem:[%s3153_s7 + $0x10] sm:$0xff]  }
 0x1c1   :  { %v1845_v30 = vpop.f32.mrf.mxu0 }
 0x1c2   :  { %v806_v57 = vadd.f32 %v805_v20, %v766_v28  ;;  %v2256_v20 = vld [vmem:[%s3153_s7 + $0x60] sm:$0xff]  }
 0x1c4   :  { %v811_v58 = vmul.f32 0.2, %v806_v57 }
 0x1c6   :  { %v812_v59 = vmax.f32 %v806_v57, %v811_v58  ;;  %v2262_v57 = vld [vmem:[%s3153_s7 + $0x48] sm:$0xff]  }
 0x1c7   :  { %v2263_v58 = vld [vmem:[%s3153_s7 + $0x8] sm:$0xff]  }
 0x1c8   :  { %v1114_v60 = vpack.c.bf16 %v812_v59, %v812_v59  ;;  %v2264_v59 = vld [vmem:[%s3153_s7 + $0x40] sm:$0xff]  }
 0x1ca   :  { %1298 = vmatprep.mubr.bf16.mxu0 %v1114_v60  ;;  %v2265_v60 = vld [vmem:[%s3153_s7] sm:$0xff]  }
 0x1cb   :  { %1299 = vmatmul.mubr.bf16.vlgmr.msra.gmra.mxu0 %v2277_v9 }
 0x1cc   :  { %1981 = vmatpush3.bf16.msra.mxu0 %v2910_v50 }
 0x1cd   :  { %1982 = vmatprep.subr.bf16.mxu0 %v2915_v51 }
 0x1d0   :  { %1983 = vmatpush3.bf16.msra.mxu0 %v2927_v53 }
 0x1d1   :  { %1984 = vmatprep.subr.bf16.mxu0 %v2934_v54 }
 0x1d4   :  { %1985 = vmatpush3.bf16.msra.mxu0 %v2948_v56 }
 0x1d5   :  { %1986 = vmatprep.subr.bf16.mxu0 %v2234_v4 }
 0x1d8   :  { %1987 = vmatpush3.bf16.msra.mxu0 %v2235_v6 }
 0x1d9   :  { %1988 = vmatprep.subr.bf16.mxu0 %v2237_v7 }
 0x1dc   :  { %1989 = vmatpush3.bf16.msra.mxu0 %v2238_v10 }
 0x1dd   :  { %1990 = vmatprep.subr.bf16.mxu0 %v2240_v11 }
 0x1e0   :  { %1991 = vmatpush3.bf16.msra.mxu0 %v2241_v13 }
 0x1e1   :  { %1992 = vmatprep.subr.bf16.mxu0 %v2243_v14  ;;  %v2250_v14 = vld [vmem:[%s3153_s7 + $0x78] sm:$0xff]  }
 0x1e4   :  { %1993 = vmatpush3.bf16.msra.mxu0 %v2244_v16  ;;  %v2252_v16 = vld [vmem:[%s3153_s7 + $0x70] sm:$0xff]  }
 0x1e5   :  { %1994 = vmatprep.subr.bf16.mxu0 %v2246_v17  ;;  %v2253_v17 = vld [vmem:[%s3153_s7 + $0x30] sm:$0xff]  }
 0x1e8   :  { %1995 = vmatpush3.bf16.msra.mxu0 %v2247_v19  ;;  %v2255_v19 = vld [vmem:[%s3153_s7 + $0x28] sm:$0xff]  }
 0x1e9   :  { %2011 = vmatprep.subr.bf16.mxu0 %v2250_v14 }
 0x1ea   :  { %v889_v9 = vpop.f32.mrf.mxu1 }
 0x1eb   :  { %v1872_v61 = vpop.f32.mrf.mxu0 }
 0x1ec   :  { %v2080_v62 = vpop.f32.mrf.mxu1 }
 0x1ed   :  { %v1873_v63 = vpop.f32.mrf.mxu0  ;;  %v2268_v62 = vld [vmem:[%s3154_s9 + $0x28] sm:$0xff]  }
 0x1ee   :  { %v1874_v0 = vadd.f32 %v1873_v63, %v1872_v61  ;;  %v892_v1 = vpop.f32.mrf.mxu1  ;;  %v2267_v61 = vld [vmem:[%s3154_s9 + $0x30] sm:$0xff]   ;;  %v2269_v63 = vld [vmem:[%s3154_s9 + $0x20] sm:$0xff]  }
 0x1ef   :  { %v1875_v2 = vpop.f32.mrf.mxu0  ;;  %v1774_v1 = vld [vmem:[%s3155_s6] ss:$0 sm:$0xff] }
 0x1f0   :  { %v850_v3 = vadd.f32 %v1874_v0, %v3024_v23  ;;  %v2081_v31 = vpop.f32.mrf.mxu1  ;;  %v2270_v0 = vld [vmem:[%s3154_s9 + $0x18] sm:$0xff]  }
 0x1f1   :  { %v1876_v32 = vpop.f32.mrf.mxu0 }
 0x1f2   :  { %v890_v33 = vadd.f32 %v889_v9, %v850_v3  ;;  %v2266_v9 = vld [vmem:[%s3154_s9 + $0x38] sm:$0xff]  }
 0x1f4   :  { %v895_v35 = vmul.f32 0.2, %v890_v33 }
 0x1f6   :  { %v896_v36 = vmax.f32 %v890_v33, %v895_v35 }
 0x1f8   :  { %v1115_v37 = vpack.c.bf16 %v896_v36, %v896_v36 }
 0x1fa   :  { %2139 = vmatmul.mubr.bf16.vlgmr.msra.gmra.mxu1 %v1115_v37 }
 0x1fb   :  { %2143 = vmatpush3.bf16.msra.mxu1 %v2905_v47  ;;  %2158 = vmatprep.mubr.msk.bf16.mxu1 %vm2276_vm1, %v2275_v34 }
 0x1fc   :  { %2144 = vmatprep.subr.bf16.mxu1 %v2275_v34 }
 0x1ff   :  { %2145 = vmatpush3.bf16.msra.mxu1 %v2921_v52 }
 0x200   :  { %2146 = vmatprep.subr.bf16.mxu1 %v2275_v34 }
 0x203   :  { %2147 = vmatpush3.bf16.msra.mxu1 %v2942_v55 }
 0x204   :  { %2148 = vmatprep.subr.bf16.mxu1 %v2275_v34 }
 0x207   :  { %2149 = vmatpush3.bf16.msra.mxu1 %v2959_v5 }
 0x208   :  { %2150 = vmatprep.subr.bf16.mxu1 %v2275_v34 }
 0x20b   :  { %2151 = vmatpush3.bf16.msra.mxu1 %v2973_v8 }
 0x20c   :  { %2152 = vmatprep.subr.bf16.mxu1 %v2275_v34 }
 0x20f   :  { %2153 = vmatpush3.bf16.msra.mxu1 %v2986_v12 }
 0x210   :  { %2154 = vmatprep.subr.bf16.mxu1 %v2275_v34 }
 0x213   :  { %2155 = vmatpush3.bf16.msra.mxu1 %v2999_v15  ;;  %v2251_v15 = vld [vmem:[%s3153_s7 + $0x38] sm:$0xff]  }
 0x214   :  { %2156 = vmatprep.subr.bf16.mxu1 %v2275_v34 }
 0x217   :  { %2157 = vmatpush3.bf16.msra.mxu1 %v3012_v18  ;;  %v2254_v18 = vld [vmem:[%s3153_s7 + $0x68] sm:$0xff]  }
 0x218   :  { %2162 = vmatprep.subr.bf16.mxu1 %v2275_v34 }
 0x21a   :  { %v973_v38 = vpop.f32.mrf.mxu1 }
 0x21b   :  { %v1903_v39 = vpop.f32.mrf.mxu0 }
 0x21c   :  { %v2100_v40 = vpop.f32.mrf.mxu1 }
 0x21d   :  { %v1904_v41 = vpop.f32.mrf.mxu0 }
 0x21e   :  { %v1905_v42 = vadd.f32 %v1904_v41, %v1903_v39  ;;  %v976_v43 = vpop.f32.mrf.mxu1 }
 0x21f   :  { %v1906_v44 = vpop.f32.mrf.mxu0 }
 0x220   :  { %v934_v45 = vadd.f32 %v1905_v42, %v3024_v23  ;;  %v2101_v46 = vpop.f32.mrf.mxu1 }
 0x221   :  { %v1907_v47 = vpop.f32.mrf.mxu0 }
 0x222   :  { %v974_v48 = vadd.f32 %v973_v38, %v934_v45 }
 0x224   :  { %v979_v49 = vmul.f32 0.2, %v974_v48 }
 0x226   :  { %v980_v50 = vmax.f32 %v974_v48, %v979_v49 }
 0x228   :  { %v1348_v51 = vpack.c.bf16 %v980_v50, %v980_v50 }
 0x22a   :  { %1382 = vmatprep.mubr.bf16.mxu0 %v1348_v51 }
 0x22b   :  { %1383 = vmatmul.mubr.bf16.vlgmr.msra.gmra.mxu0 %v1115_v37 }
 0x22c   :  { %2012 = vmatpush3.bf16.msra.mxu0 %v2251_v15 }
 0x22d   :  { %2013 = vmatprep.subr.bf16.mxu0 %v2252_v16 }
 0x230   :  { %2014 = vmatpush3.bf16.msra.mxu0 %v2253_v17 }
 0x231   :  { %2015 = vmatprep.subr.bf16.mxu0 %v2254_v18 }
 0x234   :  { %2016 = vmatpush3.bf16.msra.mxu0 %v2255_v19 }
 0x235   :  { %2017 = vmatprep.subr.bf16.mxu0 %v2256_v20 }
 0x238   :  { %2018 = vmatpush3.bf16.msra.mxu0 %v2257_v21 }
 0x239   :  { %2019 = vmatprep.subr.bf16.mxu0 %v2258_v22 }
 0x24a   :  { %v1057_v52 = vpop.f32.mrf.mxu1 }
 0x24b   :  { %v1934_v53 = vpop.f32.mrf.mxu0 }
 0x24c   :  { %v2120_v54 = vpop.f32.mrf.mxu1 }
 0x24d   :  { %v1935_v55 = vpop.f32.mrf.mxu0  ;;  %v2272_v54 = vld [vmem:[%s3154_s9 + $0x8] sm:$0xff]  }
 0x24e   :  { %v1936_v56 = vadd.f32 %v1935_v55, %v1934_v53  ;;  %v1060_v4 = vpop.f32.mrf.mxu1  ;;  %v2271_v53 = vld [vmem:[%s3154_s9 + $0x10] sm:$0xff]   ;;  %v2273_v55 = vld [vmem:[%s3154_s9] sm:$0xff]  }
 0x24f   :  { %v1937_v5 = vpop.f32.mrf.mxu0  ;;  %v1799_v4 = vld [vmem:[%s3156_s8] ss:$0 sm:$0xff] }
 0x250   :  { %v1018_v6 = vadd.f32 %v1936_v56, %v3024_v23  ;;  %v2121_v7 = vpop.f32.mrf.mxu1  ;;  %v2259_v23 = vld [vmem:[%s3153_s7 + $0x18] sm:$0xff]  }
 0x251   :  { %v1938_v8 = vpop.f32.mrf.mxu0  ;;  %2020 = vmatpush3.bf16.msra.mxu0 %v2259_v23 }
 0x252   :  { %v1058_v10 = vadd.f32 %v1057_v52, %v1018_v6  ;;  %2021 = vmatprep.subr.bf16.mxu0 %v2260_v24 }
 0x254   :  { %v1063_v11 = vmul.f32 0.2, %v1058_v10 }
 0x255   :  { %2022 = vmatpush3.bf16.msra.mxu0 %v2261_v25 }
 0x256   :  { %v1064_v12 = vmax.f32 %v1058_v10, %v1063_v11  ;;  %2023 = vmatprep.subr.bf16.mxu0 %v2262_v57 }
 0x258   :  { %v1349_v13 = vpack.c.bf16 %v1064_v12, %v1064_v12 }
 0x259   :  { %2024 = vmatpush3.bf16.msra.mxu0 %v2263_v58 }
 0x25a   :  { %2159 = vmatmul.mubr.bf16.vlgmr.msra.gmra.mxu1 %v1349_v13  ;;  %2025 = vmatprep.subr.bf16.mxu0 %v2264_v59 }
 0x25b   :  { %2178 = vmatprep.mubr.msk.bf16.mxu1 %vm2276_vm1, %v2275_v34  ;;  %2163 = vmatpush3.bf16.msra.mxu1 %v2266_v9 }
 0x25c   :  { %2164 = vmatprep.subr.bf16.mxu1 %v2275_v34 }
 0x25d   :  { %2026 = vmatpush3.bf16.msra.mxu0 %v2265_v60 }
 0x25f   :  { %2165 = vmatpush3.bf16.msra.mxu1 %v2267_v61 }
 0x260   :  { %2166 = vmatprep.subr.bf16.mxu1 %v2275_v34 }
 0x263   :  { %2167 = vmatpush3.bf16.msra.mxu1 %v2268_v62 }
 0x264   :  { %2168 = vmatprep.subr.bf16.mxu1 %v2275_v34 }
 0x267   :  { %2169 = vmatpush3.bf16.msra.mxu1 %v2269_v63 }
 0x268   :  { %2170 = vmatprep.subr.bf16.mxu1 %v2275_v34 }
 0x26b   :  { %2171 = vmatpush3.bf16.msra.mxu1 %v2270_v0 }
 0x26c   :  { %2172 = vmatprep.subr.bf16.mxu1 %v2275_v34 }
 0x26f   :  { %2173 = vmatpush3.bf16.msra.mxu1 %v2271_v53 }
 0x270   :  { %2174 = vmatprep.subr.bf16.mxu1 %v2275_v34 }
 0x273   :  { %2175 = vmatpush3.bf16.msra.mxu1 %v2272_v54 }
 0x274   :  { %2176 = vmatprep.subr.bf16.mxu1 %v2275_v34  ;;  %v1816_v34 = vld [vmem:[%s3157_s10] ss:$0 sm:$0xff] }
 0x277   :  { %2177 = vmatpush3.bf16.msra.mxu1 %v2273_v55 }
 0x28b   :  { %v1965_v26 = vpop.f32.mrf.mxu0 }
 0x28d   :  { %v1966_v27 = vpop.f32.mrf.mxu0 }
 0x28e   :  { %v1967_v28 = vadd.f32 %v1966_v27, %v1965_v26 }
 0x28f   :  { %v1968_v29 = vpop.f32.mrf.mxu0 }
 0x290   :  { %v1301_v2 = vadd.f32 %v1967_v28, %v1774_v1 }
 0x291   :  { %v1969_v30 = vpop.f32.mrf.mxu0 }
 0x2ba   :  { %v1340_v3 = vpop.f32.mrf.mxu1 }
 0x2bb   :  { %v1341_v31 = vadd.f32 %v1340_v3, %v1301_v2 }
 0x2bc   :  { %v2140_v32 = vpop.f32.mrf.mxu1 }
 0x2bd   :  { %v1346_v42 = vmul.f32 0.2, %v1341_v31 }
 0x2be   :  { %v1343_v33 = vpop.f32.mrf.mxu1 }
 0x2bf   :  { %v1347_v47 = vmax.f32 %v1341_v31, %v1346_v42 }
 0x2c0   :  { %v2141_v35 = vpop.f32.mrf.mxu1 }
 0x2c1   :  { %v1432_v52 = vpack.c.bf16 %v1347_v47, %v1347_v47 }
 0x2eb   :  { %v1996_v36 = vpop.f32.mrf.mxu0 }
 0x2ed   :  { %v1997_v37 = vpop.f32.mrf.mxu0 }
 0x2ee   :  { %v1998_v40 = vadd.f32 %v1997_v37, %v1996_v36 }
 0x2ef   :  { %v1999_v38 = vpop.f32.mrf.mxu0 }
 0x2f0   :  { %v1385_v41 = vadd.f32 %v1998_v40, %v1774_v1 }
 0x2f1   :  { %v2000_v39 = vpop.f32.mrf.mxu0 }
 0x31a   :  { %v1424_v43 = vpop.f32.mrf.mxu1 }
 0x31b   :  { %v1425_v44 = vadd.f32 %v1424_v43, %v1385_v41 }
 0x31c   :  { %v2160_v45 = vpop.f32.mrf.mxu1 }
 0x31d   :  { %v1430_v46 = vmul.f32 0.2, %v1425_v44 }
 0x31e   :  { %v1427_v48 = vpop.f32.mrf.mxu1 }
 0x31f   :  { %v1431_v49 = vmax.f32 %v1425_v44, %v1430_v46 }
 0x320   :  { %v2161_v50 = vpop.f32.mrf.mxu1 }
 0x321   :  { %v1433_v51 = vpack.c.bf16 %v1431_v49, %v1431_v49 }
 0x323   :  { %1601 = vmatprep.mubr.bf16.mxu0 %v1433_v51 }
 0x324   :  { %1602 = vmatmul.mubr.bf16.vlgmr.msra.gmra.mxu0 %v1432_v52 }
 0x3e4   :  { %v2027_v56 = vpop.f32.mrf.mxu0 }
 0x3e6   :  { %v2028_v5 = vpop.f32.mrf.mxu0 }
 0x3e7   :  { %v2029_v6 = vadd.f32 %v2028_v5, %v2027_v56 }
 0x3e8   :  { %v2030_v7 = vpop.f32.mrf.mxu0 }
 0x3e9   :  { %v1604_v8 = vadd.f32 %v2029_v6, %v1799_v4 }
 0x3ea   :  { %v2031_v10 = vpop.f32.mrf.mxu0 }
 0x3eb   :  { %v1609_v11 = vmul.f32 0.2, %v1604_v8 }
 0x3ed   :  { %v1610_v12 = vmax.f32 %v1604_v8, %v1609_v11 }
 0x3ef   :  { %v1611_v13 = vpack.c.bf16 %v1610_v12, %v1610_v12 }
 0x3f1   :  { %2179 = vmatmul.mubr.bf16.vlgmr.msra.gmra.mxu1 %v1611_v13 }
 0x4b1   :  { %v1717_v14 = vpop.f32.mrf.mxu1 }
 0x4b2   :  { %v1718_v15 = vadd.f32 %v1816_v34, %v1717_v14 }
 0x4b3   :  { %v2180_v16 = vpop.f32.mrf.mxu1 }
 0x4b4   :  { %1723 = vst [vmem:[%s3158_s11] sm:$0xf] %v1718_v15 }
 0x4b5   :  { %v1720_v17 = vpop.f32.mrf.mxu1 }
 0x4b7   :  { %v2181_v18 = vpop.f32.mrf.mxu1 }

</bundles_post_ra>
